<compile_context>
chip_gen: v6e
topology: v6e:2x2x1
jax: 0.10.0
libtpu: 0.0.40
codegen_flags: <defaults>
</compile_context>

<pallas_src>
import jax
import jax.numpy as jnp
from jax import lax
from jax.experimental import pallas as pl
from jax.experimental.pallas import tpu as pltpu


def mlp_kernel(x_ref, w1t_ref, b1_ref, w2t_ref, b2_ref, w3_ref, b3_ref, o_ref):
    # x_ref: (TB, 17) f32 block, read directly in its native layout; cast for the MXU.
    xb = x_ref[...].astype(jnp.bfloat16)                      # (TB, 17) bf16

    # Layer 1: contract the 17-feature axis of w1t (32,17) with the 17-feature axis of
    # x (TB,17) -> feature-major (32, TB); f32 accumulate, bias + ReLU in f32.
    h1 = lax.dot_general(
        w1t_ref[...], xb,
        dimension_numbers=(((1,), (1,)), ((), ())),
        preferred_element_type=jnp.float32,
    ) + b1_ref[...]                                            # (32, TB) f32
    h1 = jnp.maximum(h1, 0.0)
    # Dropout(0.2): identity in eval mode.

    # Layer 2: (48,32) @ (32,TB) -> (48,TB), f32 accumulate.
    h2 = jnp.dot(
        w2t_ref[...], h1.astype(jnp.bfloat16),
        preferred_element_type=jnp.float32,
    ) + b2_ref[...]                                            # (48, TB) f32
    h2 = jnp.maximum(h2, 0.0)
    # Dropout(0.2): identity in eval mode.

    # Layer 3 (48 -> 1) off the MXU: VPU multiply by the (48,1) weight column,
    # sublane reduction on the XLU. Full f32 precision for the output layer.
    out = jnp.sum(h2 * w3_ref[...], axis=0, keepdims=True) + b3_ref[...]  # (1, TB)
    o_ref[...] = out.astype(o_ref.dtype)


def _choose_tile_b(B, *, preferred=4096, multiple=512, min_grid=4):
    """Large lane-dense batch tiles, capped so the grid keeps >= min_grid steps
    (2 TensorCores on v7x x headroom) and padding waste stays modest."""
    per_step = pl.cdiv(B, min_grid)
    tb = min(preferred, pl.cdiv(per_step, multiple) * multiple)
    return max(tb, multiple)


def mlp_forward(x, params, *, tile_b=None, min_kernel_batch=4096):
    """x: (B, 17) f32. Returns (B, 1) f32."""
    w1, b1, w2, b2, w3, b3 = params  # w: (in, out) f32, b: (1, out) f32
    B = x.shape[0]

    # Small batches: fixed pallas_call / grid-step overhead exceeds the cost of a
    # fused XLA dot chain for this tiny MLP, so bypass the kernel.
    if B < min_kernel_batch:
        h = jnp.maximum(x @ w1 + b1, 0.0)
        h = jnp.maximum(h @ w2 + b2, 0.0)
        return h @ w3 + b3

    if tile_b is None:
        tile_b = _choose_tile_b(B)

    B_pad = pl.cdiv(B, tile_b) * tile_b
    x_in = x if B_pad == B else jnp.pad(x, ((0, B_pad - B), (0, 0)))       # (B_pad, 17) f32

    # Weights are tiny; cast once for the MXU layers. Layer-3 weight stays f32 (VPU path).
    w1t = w1.T.astype(jnp.bfloat16)                                        # (32, 17) bf16
    w2t = w2.T.astype(jnp.bfloat16)                                        # (48, 32) bf16
    b1c = b1.reshape(-1, 1)                                                # (32, 1) f32
    b2c = b2.reshape(-1, 1)                                                # (48, 1) f32
    w3c = w3.reshape(-1, 1).astype(jnp.float32)                            # (48, 1) f32
    b3c = b3.reshape(1, 1)                                                 # (1, 1)  f32

    grid = (B_pad // tile_b,)

    flops = 2 * B_pad * (17 * 32 + 32 * 48 + 48 * 1)
    weight_bytes = sum(
        a.size * a.dtype.itemsize for a in (w1t, b1c, w2t, b2c, w3c, b3c)
    )
    bytes_accessed = x_in.size * x_in.dtype.itemsize + B_pad * 4 + weight_bytes

    # Note: at tile_b <= 8192 the VMEM footprint (double-buffered f32 x block +
    # f32 (32,TB)/(48,TB) temporaries) stays well under even v5e's 16 MiB default
    # scoped VMEM, so no vmem_limit_bytes override is needed.
    out_t = pl.pallas_call(
        mlp_kernel,
        out_shape=jax.ShapeDtypeStruct((1, B_pad), jnp.float32),
        grid_spec=pltpu.PrefetchScalarGridSpec(
            num_scalar_prefetch=0,
            grid=grid,
            in_specs=[
                # x blocks stream over the batch in native (B,17) f32 layout;
                # weights/biases use constant index_maps -> VMEM-resident.
                pl.BlockSpec((tile_b, 17), lambda i: (i, 0)),
                pl.BlockSpec(w1t.shape, lambda i: (0, 0)),
                pl.BlockSpec(b1c.shape, lambda i: (0, 0)),
                pl.BlockSpec(w2t.shape, lambda i: (0, 0)),
                pl.BlockSpec(b2c.shape, lambda i: (0, 0)),
                pl.BlockSpec(w3c.shape, lambda i: (0, 0)),
                pl.BlockSpec(b3c.shape, lambda i: (0, 0)),
            ],
            out_specs=pl.BlockSpec((1, tile_b), lambda i: (0, i)),
        ),
        compiler_params=pltpu.CompilerParams(
            dimension_semantics=("parallel",),
        ),
        cost_estimate=pl.CostEstimate(
            flops=flops, transcendentals=0, bytes_accessed=bytes_accessed
        ),
    )(x_in, w1t, b1c, w2t, b2c, w3c, b3c)

    return out_t[:, :B].T  # (B, 1)


def init_params(key):
    # Deterministic init mimicking nn.Linear defaults (uniform in +/- 1/sqrt(fan_in)).
    def linear_init(k, fan_in, fan_out):
        kw, kb = jax.random.split(k)
        bound = 1.0 / jnp.sqrt(jnp.float32(fan_in))
        w = jax.random.uniform(kw, (fan_in, fan_out), jnp.float32, -bound, bound)
        b = jax.random.uniform(kb, (1, fan_out), jnp.float32, -bound, bound)
        return w, b

    k1, k2, k3 = jax.random.split(key, 3)
    w1, b1 = linear_init(k1, 17, 32)
    w2, b2 = linear_init(k2, 32, 48)
    w3, b3 = linear_init(k3, 48, 1)
    return (w1, b1, w2, b2, w3, b3)


if __name__ == "__main__":
    key = jax.random.PRNGKey(0)
    kx, kp = jax.random.split(key)

    # Just over the kernel-path crossover: adaptive tiling picks tile_b=1024, grid=(4,),
    # exercising the parallel batch grid while staying a small, fast test.
    B = 4096
    x = jax.random.normal(kx, (B, 17), dtype=jnp.float32)
    params = init_params(kp)

    out = mlp_forward(x, params)
    out = jax.block_until_ready(out)

    # Sanity check against plain-JAX f32 reference (eval-mode dropout = identity).
    # Tolerance relaxed because layers 1/2 feed the MXU bf16 inputs (f32 accumulation);
    # layer 3 is computed entirely in f32.
    w1, b1, w2, b2, w3, b3 = params
    ref = jnp.maximum(x @ w1 + b1, 0.0)
    ref = jnp.maximum(ref @ w2 + b2, 0.0)
    ref = ref @ w3 + b3
    assert out.shape == (B, 1)
    assert jnp.allclose(out, ref, atol=5e-2, rtol=5e-2), (
        float(jnp.max(jnp.abs(out - ref)))
    )

    # Also exercise the small-batch fallback path once for coverage.
    out_small = jax.block_until_ready(mlp_forward(x[:8], params))
    assert out_small.shape == (8, 1)
    assert jnp.allclose(out_small, ref[:8], atol=1e-4, rtol=1e-4)

    print("KERNEL_OK")
</pallas_src>

<mosaic_0001>
module attributes {stable_mosaic.version = 11 : i64} {
  func.func @mlp_kernel(%arg0: i32, %arg1: memref<1024x17xf32, #tpu.memory_space<vmem>>, %arg2: memref<32x17xbf16, #tpu.memory_space<vmem>>, %arg3: memref<32x1xf32, #tpu.memory_space<vmem>>, %arg4: memref<48x32xbf16, #tpu.memory_space<vmem>>, %arg5: memref<48x1xf32, #tpu.memory_space<vmem>>, %arg6: memref<48x1xf32, #tpu.memory_space<vmem>>, %arg7: memref<1x1xf32, #tpu.memory_space<vmem>>, %arg8: memref<1x1024xf32, #tpu.memory_space<vmem>>) attributes {dimension_semantics = [#tpu.dimension_semantics<parallel>], iteration_bounds = array<i64: 4>, scalar_prefetch = 0 : i64, scratch_operands = 0 : i64, tpu.core_type = #tpu.core_type<tc>, window_params = [{transform_indices = @transform_0, window_bounds = array<i64: 1024, 17>}, {pipeline_mode = #tpu.pipeline_mode<synchronous>, transform_indices = @transform_1, window_bounds = array<i64: 32, 17>}, {pipeline_mode = #tpu.pipeline_mode<synchronous>, transform_indices = @transform_2, window_bounds = array<i64: 32, 1>}, {pipeline_mode = #tpu.pipeline_mode<synchronous>, transform_indices = @transform_3, window_bounds = array<i64: 48, 32>}, {pipeline_mode = #tpu.pipeline_mode<synchronous>, transform_indices = @transform_4, window_bounds = array<i64: 48, 1>}, {pipeline_mode = #tpu.pipeline_mode<synchronous>, transform_indices = @transform_5, window_bounds = array<i64: 48, 1>}, {pipeline_mode = #tpu.pipeline_mode<synchronous>, transform_indices = @transform_6, window_bounds = array<i64: 1, 1>}, {transform_indices = @transform_7, window_bounds = array<i64: 1, 1024>}]} {
    %c0 = arith.constant 0 : index
    %c0_0 = arith.constant 0 : index
    %0 = vector.load %arg1[%c0, %c0_0] : memref<1024x17xf32, #tpu.memory_space<vmem>>, vector<1024x17xf32>
    %1 = arith.truncf %0 : vector<1024x17xf32> to vector<1024x17xbf16>
    %c0_1 = arith.constant 0 : index
    %c0_2 = arith.constant 0 : index
    %2 = vector.load %arg2[%c0_1, %c0_2] : memref<32x17xbf16, #tpu.memory_space<vmem>>, vector<32x17xbf16>
    %cst = arith.constant dense<0.000000e+00> : vector<32x1024xf32>
    %3 = tpu.matmul %2, %1, %cst {dimension_numbers = #tpu.dot_dimension_numbers<[1], [1], [0], [0], [0, 0, 1, 0], [], []>} : vector<32x17xbf16>, vector<1024x17xbf16>, vector<32x1024xf32> -> vector<32x1024xf32>
    %c0_3 = arith.constant 0 : index
    %c0_4 = arith.constant 0 : index
    %4 = vector.load %arg3[%c0_3, %c0_4] : memref<32x1xf32, #tpu.memory_space<vmem>>, vector<32x1xf32>
    %5 = vector.broadcast %4 : vector<32x1xf32> to vector<32x1024xf32>
    %6 = arith.addf %3, %5 : vector<32x1024xf32>
    %cst_5 = arith.constant 0.000000e+00 : f32
    %7 = vector.broadcast %cst_5 : f32 to vector<32x1024xf32>
    %8 = arith.maximumf %6, %7 : vector<32x1024xf32>
    %c0_6 = arith.constant 0 : index
    %c0_7 = arith.constant 0 : index
    %9 = vector.load %arg4[%c0_6, %c0_7] : memref<48x32xbf16, #tpu.memory_space<vmem>>, vector<48x32xbf16>
    %10 = arith.truncf %8 : vector<32x1024xf32> to vector<32x1024xbf16>
    %cst_8 = arith.constant dense<0.000000e+00> : vector<48x1024xf32>
    %11 = tpu.matmul %9, %10, %cst_8 {dimension_numbers = #tpu.dot_dimension_numbers<[1], [0], [0], [1], [0, 0, 1, 1], [], []>} : vector<48x32xbf16>, vector<32x1024xbf16>, vector<48x1024xf32> -> vector<48x1024xf32>
    %c0_9 = arith.constant 0 : index
    %c0_10 = arith.constant 0 : index
    %12 = vector.load %arg5[%c0_9, %c0_10] : memref<48x1xf32, #tpu.memory_space<vmem>>, vector<48x1xf32>
    %13 = vector.broadcast %12 : vector<48x1xf32> to vector<48x1024xf32>
    %14 = arith.addf %11, %13 : vector<48x1024xf32>
    %cst_11 = arith.constant 0.000000e+00 : f32
    %15 = vector.broadcast %cst_11 : f32 to vector<48x1024xf32>
    %16 = arith.maximumf %14, %15 : vector<48x1024xf32>
    %c0_12 = arith.constant 0 : index
    %c0_13 = arith.constant 0 : index
    %17 = vector.load %arg6[%c0_12, %c0_13] : memref<48x1xf32, #tpu.memory_space<vmem>>, vector<48x1xf32>
    %18 = vector.broadcast %17 : vector<48x1xf32> to vector<48x1024xf32>
    %19 = arith.mulf %16, %18 : vector<48x1024xf32>
    %cst_14 = arith.constant dense<0.000000e+00> : vector<1024xf32>
    %20 = vector.multi_reduction <add>, %19, %cst_14 [0] : vector<48x1024xf32> to vector<1024xf32>
    %21 = vector.shape_cast %20 : vector<1024xf32> to vector<1x1024xf32>
    %c0_15 = arith.constant 0 : index
    %c0_16 = arith.constant 0 : index
    %22 = vector.load %arg7[%c0_15, %c0_16] : memref<1x1xf32, #tpu.memory_space<vmem>>, vector<1x1xf32>
    %23 = vector.broadcast %22 : vector<1x1xf32> to vector<1x1024xf32>
    %24 = arith.addf %21, %23 : vector<1x1024xf32>
    %c0_17 = arith.constant 0 : index
    %c0_18 = arith.constant 0 : index
    %25 = vector.load %arg8[%c0_17, %c0_18] : memref<1x1024xf32, #tpu.memory_space<vmem>>, vector<1x1024xf32>
    tpu.vector_store %arg8[%c0_17, %c0_18], %24 {strides = array<i32>} : memref<1x1024xf32, #tpu.memory_space<vmem>>, vector<1x1024xf32>,
    return
  }
  func.func @transform_0(%arg0: i32) -> (i32, i32) {
    %c0_i32 = arith.constant 0 : i32
    %c0_i32_0 = arith.constant 0 : i32
    return %arg0, %c0_i32 : i32, i32
  }
  func.func @transform_1(%arg0: i32) -> (i32, i32) {
    %c0_i32 = arith.constant 0 : i32
    %c0_i32_0 = arith.constant 0 : i32
    %c0_i32_1 = arith.constant 0 : i32
    return %c0_i32, %c0_i32_0 : i32, i32
  }
  func.func @transform_2(%arg0: i32) -> (i32, i32) {
    %c0_i32 = arith.constant 0 : i32
    %c0_i32_0 = arith.constant 0 : i32
    %c0_i32_1 = arith.constant 0 : i32
    return %c0_i32, %c0_i32_0 : i32, i32
  }
  func.func @transform_3(%arg0: i32) -> (i32, i32) {
    %c0_i32 = arith.constant 0 : i32
    %c0_i32_0 = arith.constant 0 : i32
    %c0_i32_1 = arith.constant 0 : i32
    return %c0_i32, %c0_i32_0 : i32, i32
  }
  func.func @transform_4(%arg0: i32) -> (i32, i32) {
    %c0_i32 = arith.constant 0 : i32
    %c0_i32_0 = arith.constant 0 : i32
    %c0_i32_1 = arith.constant 0 : i32
    return %c0_i32, %c0_i32_0 : i32, i32
  }
  func.func @transform_5(%arg0: i32) -> (i32, i32) {
    %c0_i32 = arith.constant 0 : i32
    %c0_i32_0 = arith.constant 0 : i32
    %c0_i32_1 = arith.constant 0 : i32
    return %c0_i32, %c0_i32_0 : i32, i32
  }
  func.func @transform_6(%arg0: i32) -> (i32, i32) {
    %c0_i32 = arith.constant 0 : i32
    %c0_i32_0 = arith.constant 0 : i32
    %c0_i32_1 = arith.constant 0 : i32
    return %c0_i32, %c0_i32_0 : i32, i32
  }
  func.func @transform_7(%arg0: i32) -> (i32, i32) {
    %c0_i32 = arith.constant 0 : i32
    %c0_i32_0 = arith.constant 0 : i32
    return %c0_i32, %arg0 : i32, i32
  }
}

</mosaic_0001>

<bundles_post_ra>
// kernel: tpu_custom_call.1
= control target key start
LH: loop header
LB: loop body
LE: loop exit
PB: predicated region body
PF: predicated region fallthrough
CT: control target
= control target key end

     0   :  { %s2571_s0 = inlined_call_operand.vmem [shape: f32[4096,17], index: 0, kind: input, shape index: {}]   ;;  %s2572_s1 = inlined_call_operand.vmem [shape: bf16[32,17], index: 1, kind: input, shape index: {}]   ;;  %s2573_s2 = inlined_call_operand.vmem [shape: f32[32,1], index: 2, kind: input, shape index: {}]   ;;  %s2574_s3 = inlined_call_operand.vmem [shape: bf16[48,32], index: 3, kind: input, shape index: {}]   ;;  %s2575_s4 = inlined_call_operand.vmem [shape: f32[48,1], index: 4, kind: input, shape index: {}]   ;;  %s2576_s5 = inlined_call_operand.vmem [shape: f32[48,1], index: 5, kind: input, shape index: {}]   ;;  %s2577_s6 = inlined_call_operand.<no memory space> [shape: f32[1,1], index: 6, kind: input, shape index: {}]   ;;  %s2578_s7 = inlined_call_operand.hbm [shape: f32[1,4096], index: 7, kind: output, shape index: {}]  }
   0x1   :  { %v12_v0 = vstv %s2577_s6 }
   0x2   :  { %13 = vst [vmem:[#allocation2] sm:$0x1] %v12_v0 }
   0x3   :  { %14 = vsyncpa [#allocation4], 0 }
   0x4   :  { %16 = vsyncpa [#allocation4 + $0x1], 0  ;;  %s1968_s26 = smov 0   ;;  %s1970_s27 = smov 0  }
   0x5   :  { %s1972_s28 = smov 0   ;;  %s1974_s29 = smov 0  }
   0x6 LB: > { %s1661_s6 = sadd.s32 4294967295, %s1920_s29   ;;  %s1662_s30 = sadd.s32 4294967294, %s1920_s29   ;;  %s1920_s29 = sphi %s1974_s29, %s2584_s29   ;;  %s1916_s28 = sphi %s1972_s28, %s2583_s28   ;;  %s1912_s27 = sphi %s1970_s27, %s2582_s27   ;;  %s1908_s26 = sphi %s1968_s26, %s2581_s26  }
   0x7   : > { %s1991_s8 = sadd.s32 1, %s1920_s29   ;;  %s181_s9 = sadd.s32 1, %s1916_s28 }
   0x8   : > { %s178_s10 = ssub.s32 %s1920_s29, %s1991_s8  ;;  %p191_p0 = scmp.ne.s32.totalorder %s1916_s28, %s1912_s27 }
   0x9   : > { %p179_p1 = scmp.eq.s32.totalorder %s178_s10, 0  ;;  %p192_p2 = scmp.eq.s32.totalorder %s1661_s6, 3 }
   0xa   : > { %p197_p3 = scmp.ne.s32.totalorder %s1912_s27, %s1908_s26  ;;  %p198_p4 = scmp.eq.s32.totalorder %s1662_s30, 3 }
   0xb   : > { %s2001_s11 = scalar_select %p179_p1, %s1916_s28, %s181_s9  }
   0xc   : > { %p2003_p5 = por %p192_p2, %p191_p0  ;;  %p2007_p6 = por %p198_p4, %p197_p3 }
   0xd   : > { %p1665_p7 = scmp.ge.s32.totalorder %s1920_s29, 1  ;;  %p243_p8 = scmp.lt.s32.totalorder %s1920_s29, 5 }
   0xf   : > { %p244_p9 = pnand %p1665_p7, %p243_p8 }
  0x10   : > { %s2013_s14 = sshll.u32 (!%p244_p9), %s1661_s6, 7 }
  0x11   : > { %247 = sbr.rel (%p244_p9) target bundleno = 641 (0x281), region = 48  ;;  %p276_p10 = scmp.lt.s32.totalorder (!%p244_p9), %s2013_s14, 511 }
  0x12   : > { %s1601_s25 = scalar_lea.hbm (!%p244_p9), %s2578_s7, %s2013_s14 }
  0x16   : > { %v2019_v1 = vld [vmem:[%s2572_s1] sm:$0xff]   ;;  %vm513_vm0 = vcmask 138240   ;;  %s277_s17 = scalar_select %p276_p10, %s2013_s14, 511  ;;  %v1922_v30 = vmov 0   ;;  %vm1029_vm1 = vcmask 261120  }
  0x17   : > { %1716 = vmatprep.mubr.msk.bf16.mxu0 %vm513_vm0, %v2019_v1  ;;  %1736 = vmatprep.mubr.msk.bf16.mxu1 %vm513_vm0, %v2019_v1 }
  0x18   : > { %s1668_s18 = sshll.u32 %s277_s17, 3  ;;  %1854 = vset.pattern.permute.xlu1 %v1922_v30  ;;  %1853 = vset.pattern.permute.xlu0 %v1922_v30 }
  0x19   : > { %s2029_s21 = scalar_lea.vmem %s2571_s0, %s1668_s18  ;;  %s272_s18 = sand.u32 1, %s1912_s27  }
  0x1a   : > { %v313_v2 = vld [vmem:[%s2029_s21 + $0xf0] sm:$0xff]  ;;  %v314_v3 = vld [vmem:[%s2029_s21 + $0xf8] sm:$0xff]  ;;  %v311_v13 = vld [vmem:[%s2029_s21 + $0xe0] sm:$0xff]  ;;  %s1666_s19 = sshll.u32 %s272_s18, 3  ;;  %s1589_s6 = scalar_lea.sflag [#allocation4], %s272_s18 }
  0x1b   : > { %v345_v4 = vld [vmem:[%s2029_s21 + $0x1f0] sm:$0xff]  ;;  %v426_v5 = vpack.c.bf16 %v314_v3, %v313_v2  ;;  %v346_v6 = vld [vmem:[%s2029_s21 + $0x1f8] sm:$0xff]  ;;  %v312_v15 = vld [vmem:[%s2029_s21 + $0xe8] sm:$0xff]  ;;  %s274_s20 = scalar_lea.vmem [#allocation3], %s1666_s19 }
  0x1c   : > { %v297_v7 = vld [vmem:[%s2029_s21 + $0x70] sm:$0xff]  ;;  %v298_v8 = vld [vmem:[%s2029_s21 + $0x78] sm:$0xff]  ;;  %v442_v9 = vpack.c.bf16 %v346_v6, %v345_v4  ;;  %v343_v16 = vld [vmem:[%s2029_s21 + $0x1e0] sm:$0xff]  ;;  %v425_v19 = vpack.c.bf16 %v312_v15, %v311_v13  ;;  %s1603_s22 = sshll.u32 %s274_s20, 4  ;;  %s1604_s22 = int_to_ptr.vmem [resolvable:$true] %s1603_s22 }
  0x1d   : > { %v418_v10 = vpack.c.bf16 %v298_v8, %v297_v7  ;;  %v329_v11 = vld [vmem:[%s2029_s21 + $0x170] sm:$0xff]  ;;  %v330_v12 = vld [vmem:[%s2029_s21 + $0x178] sm:$0xff]  ;;  %1780 = vmatprep.subr.msk.bf16.mxu0 %vm513_vm0, %v426_v5  ;;  %v344_v17 = vld [vmem:[%s2029_s21 + $0x1e8] sm:$0xff]  ;;  %s1860_s30 = scalar_lea.vmem %s1604_s22, 128 }
  0x1e   : > { %v434_v14 = vpack.c.bf16 %v330_v12, %v329_v11  ;;  %1788 = vmatprep.subr.msk.bf16.mxu1 %vm513_vm0, %v442_v9  ;;  %v441_v20 = vpack.c.bf16 %v344_v17, %v343_v16  ;;  %v295_v21 = vld [vmem:[%s2029_s21 + $0x60] sm:$0xff]  ;;  %v296_v22 = vld [vmem:[%s2029_s21 + $0x68] sm:$0xff]  ;;  %v309_v28 = vld [vmem:[%s2029_s21 + $0xd0] sm:$0xff]  ;;  %p1861_p11 = scmp.ne.s32.totalorder %s1604_s22, %s1860_s30 }
  0x1f   : > { %v542_v18 = vsel %vm513_vm0, %v418_v10, 0  ;;  %v327_v23 = vld [vmem:[%s2029_s21 + $0x160] sm:$0xff]  ;;  %v328_v25 = vld [vmem:[%s2029_s21 + $0x168] sm:$0xff]  ;;  %v417_v26 = vpack.c.bf16 %v296_v22, %v295_v21  ;;  %v310_v29 = vld [vmem:[%s2029_s21 + $0xd8] sm:$0xff] }
  0x20   : > { %1701 = vmatpush3.bf16.xpose.msra.mxu0 %v542_v18  ;;  %v590_v24 = vsel %vm513_vm0, %v434_v14, 0  ;;  %v433_v27 = vpack.c.bf16 %v328_v25, %v327_v23  ;;  %v341_v31 = vld [vmem:[%s2029_s21 + $0x1d0] sm:$0xff]  ;;  %v342_v32 = vld [vmem:[%s2029_s21 + $0x1d8] sm:$0xff]  ;;  %v424_v34 = vpack.c.bf16 %v310_v29, %v309_v28  ;;  %v307_v43 = vld [vmem:[%s2029_s21 + $0xc0] sm:$0xff]  ;;  %p1862_p12 = pnand %p1861_p11, %p2003_p5 }
  0x21   : > { %1721 = vmatpush3.bf16.xpose.msra.mxu1 %v590_v24  ;;  %1781 = vmatprep.subr.msk.bf16.mxu0 %vm513_vm0, %v425_v19  ;;  %v539_v33 = vsel %vm513_vm0, %v417_v26, 0  ;;  %v440_v36 = vpack.c.bf16 %v342_v32, %v341_v31  ;;  %v293_v37 = vld [vmem:[%s2029_s21 + $0x50] sm:$0xff]  ;;  %v294_v38 = vld [vmem:[%s2029_s21 + $0x58] sm:$0xff]  ;;  %v308_v44 = vld [vmem:[%s2029_s21 + $0xc8] sm:$0xff] }
  0x22   : > { %1789 = vmatprep.subr.msk.bf16.mxu1 %vm513_vm0, %v441_v20  ;;  %v587_v35 = vsel %vm513_vm0, %v433_v27, 0  ;;  %v325_v39 = vld [vmem:[%s2029_s21 + $0x150] sm:$0xff]  ;;  %v326_v40 = vld [vmem:[%s2029_s21 + $0x158] sm:$0xff]  ;;  %v416_v41 = vpack.c.bf16 %v294_v38, %v293_v37  ;;  %v339_v45 = vld [vmem:[%s2029_s21 + $0x1c0] sm:$0xff]  ;;  %v423_v48 = vpack.c.bf16 %v308_v44, %v307_v43  ;;  %p1863_p13 = pneg %p1862_p12 }
  0x23   : > { %v432_v42 = vpack.c.bf16 %v326_v40, %v325_v39  ;;  %v340_v46 = vld [vmem:[%s2029_s21 + $0x1c8] sm:$0xff]  ;;  %v291_v51 = vld [vmem:[%s2029_s21 + $0x40] sm:$0xff]  ;;  %v305_v57 = vld [vmem:[%s2029_s21 + $0xb0] sm:$0xff] }
  0x24   : > { %v536_v47 = vsel %vm513_vm0, %v416_v41, 0  ;;  %v439_v50 = vpack.c.bf16 %v340_v46, %v339_v45  ;;  %v292_v52 = vld [vmem:[%s2029_s21 + $0x48] sm:$0xff]  ;;  %v323_v53 = vld [vmem:[%s2029_s21 + $0x140] sm:$0xff]  ;;  %v306_v58 = vld [vmem:[%s2029_s21 + $0xb8] sm:$0xff] }
  0x25   : > { %v584_v49 = vsel %vm513_vm0, %v432_v42, 0  ;;  %v324_v54 = vld [vmem:[%s2029_s21 + $0x148] sm:$0xff]  ;;  %v415_v55 = vpack.c.bf16 %v292_v52, %v291_v51  ;;  %v337_v59 = vld [vmem:[%s2029_s21 + $0x1b0] sm:$0xff]  ;;  %v338_v60 = vld [vmem:[%s2029_s21 + $0x1b8] sm:$0xff]  ;;  %v422_v62 = vpack.c.bf16 %v306_v58, %v305_v57 }
  0x26   : > { %v431_v56 = vpack.c.bf16 %v324_v54, %v323_v53  ;;  %v438_v0 = vpack.c.bf16 %v338_v60, %v337_v59  ;;  %v289_v2 = vld [vmem:[%s2029_s21 + $0x30] sm:$0xff]  ;;  %v290_v3 = vld [vmem:[%s2029_s21 + $0x38] sm:$0xff]  ;;  %v303_v8 = vld [vmem:[%s2029_s21 + $0xa0] sm:$0xff] }
  0x27   : > { %v533_v61 = vsel %vm513_vm0, %v415_v55, 0  ;;  %v321_v4 = vld [vmem:[%s2029_s21 + $0x130] sm:$0xff]  ;;  %v322_v5 = vld [vmem:[%s2029_s21 + $0x138] sm:$0xff]  ;;  %v414_v6 = vpack.c.bf16 %v290_v3, %v289_v2  ;;  %v304_v9 = vld [vmem:[%s2029_s21 + $0xa8] sm:$0xff] }
  0x28   : > { %1703 = vmatpush3.bf16.xpose.msra.mxu0 %v539_v33  ;;  %v581_v63 = vsel %vm513_vm0, %v431_v56, 0  ;;  %v430_v7 = vpack.c.bf16 %v322_v5, %v321_v4  ;;  %v335_v10 = vld [vmem:[%s2029_s21 + $0x1a0] sm:$0xff]  ;;  %v336_v11 = vld [vmem:[%s2029_s21 + $0x1a8] sm:$0xff]  ;;  %v421_v13 = vpack.c.bf16 %v304_v9, %v303_v8  ;;  %v301_v22 = vld [vmem:[%s2029_s21 + $0x90] sm:$0xff] }
  0x29   : > { %1723 = vmatpush3.bf16.xpose.msra.mxu1 %v587_v35  ;;  %1782 = vmatprep.subr.msk.bf16.mxu0 %vm513_vm0, %v424_v34  ;;  %v530_v12 = vsel %vm513_vm0, %v414_v6, 0  ;;  %v437_v15 = vpack.c.bf16 %v336_v11, %v335_v10  ;;  %v287_v16 = vld [vmem:[%s2029_s21 + $0x20] sm:$0xff]  ;;  %v288_v17 = vld [vmem:[%s2029_s21 + $0x28] sm:$0xff]  ;;  %v302_v23 = vld [vmem:[%s2029_s21 + $0x98] sm:$0xff] }
  0x2a   : > { %1790 = vmatprep.subr.msk.bf16.mxu1 %vm513_vm0, %v440_v36  ;;  %v578_v14 = vsel %vm513_vm0, %v430_v7, 0  ;;  %v319_v18 = vld [vmem:[%s2029_s21 + $0x120] sm:$0xff]  ;;  %v320_v19 = vld [vmem:[%s2029_s21 + $0x128] sm:$0xff]  ;;  %v413_v20 = vpack.c.bf16 %v288_v17, %v287_v16  ;;  %v333_v24 = vld [vmem:[%s2029_s21 + $0x190] sm:$0xff]  ;;  %v420_v27 = vpack.c.bf16 %v302_v23, %v301_v22 }
  0x2b   : > { %v429_v21 = vpack.c.bf16 %v320_v19, %v319_v18  ;;  %v334_v25 = vld [vmem:[%s2029_s21 + $0x198] sm:$0xff]  ;;  %v479_v28 = vld [vmem:[%s2573_s2] sm:$0xff]  ;;  %v285_v32 = vld [vmem:[%s2029_s21 + $0x10] sm:$0xff] }
  0x2c   : > { %v527_v26 = vsel %vm513_vm0, %v413_v20, 0  ;;  %v436_v31 = vpack.c.bf16 %v334_v25, %v333_v24  ;;  %v286_v33 = vld [vmem:[%s2029_s21 + $0x18] sm:$0xff]  ;;  %485 = vperm.xlu1 %1854, %v479_v28   ;;  %v481_v34 = vld [vmem:[%s2573_s2 + $0x10] sm:$0xff]  ;;  %v480_v37 = vld [vmem:[%s2573_s2 + $0x8] sm:$0xff] }
  0x2d   : > { %v575_v29 = vsel %vm513_vm0, %v429_v21, 0  ;;  %v317_v35 = vld [vmem:[%s2029_s21 + $0x110] sm:$0xff]  ;;  %v318_v36 = vld [vmem:[%s2029_s21 + $0x118] sm:$0xff]  ;;  %495 = vperm.xlu0 %1853, %v481_v34   ;;  %v412_v39 = vpack.c.bf16 %v286_v33, %v285_v32  ;;  %v299_v41 = vld [vmem:[%s2029_s21 + $0x80] sm:$0xff] }
  0x2e   : > { %v482_v38 = vld [vmem:[%s2573_s2 + $0x18] sm:$0xff]  ;;  %v428_v40 = vpack.c.bf16 %v318_v36, %v317_v35  ;;  %v300_v42 = vld [vmem:[%s2029_s21 + $0x88] sm:$0xff]  ;;  %v331_v43 = vld [vmem:[%s2029_s21 + $0x180] sm:$0xff] }
  0x2f   : > { %v332_v44 = vld [vmem:[%s2029_s21 + $0x188] sm:$0xff]  ;;  %v978_v46 = vld [vmem:[%s2575_s4] sm:$0xff]  ;;  %v981_v55 = vld [vmem:[%s2575_s4 + $0x18] sm:$0xff] }
  0x30   : > { %1705 = vmatpush3.bf16.xpose.msra.mxu0 %v536_v47  ;;  %490 = vperm.xlu1 %1854, %v480_v37   ;;  %v979_v45 = vld [vmem:[%s2575_s4 + $0x8] sm:$0xff]  ;;  %v524_v47 = vsel %vm513_vm0, %v412_v39, 0  ;;  %v283_v51 = vld [vmem:[%s2029_s21] sm:$0xff]  ;;  %v980_v56 = vld [vmem:[%s2575_s4 + $0x10] sm:$0xff] }
  0x31   : > { %1725 = vmatpush3.bf16.xpose.msra.mxu1 %v584_v49  ;;  %1783 = vmatprep.subr.msk.bf16.mxu0 %vm513_vm0, %v423_v48  ;;  %v419_v48 = vpack.c.bf16 %v300_v42, %v299_v41  ;;  %v572_v49 = vsel %vm513_vm0, %v428_v40, 0  ;;  %v284_v52 = vld [vmem:[%s2029_s21 + $0x8] sm:$0xff]  ;;  %v315_v53 = vld [vmem:[%s2029_s21 + $0x100] sm:$0xff]  ;;  %v377_v59 = vld [vmem:[%s2029_s21 + $0x2f0] sm:$0xff] }
  0x32   : > { %1791 = vmatprep.subr.msk.bf16.mxu1 %vm513_vm0, %v439_v50  ;;  %500 = vperm.xlu0 %1853, %v482_v38   ;;  %v435_v50 = vpack.c.bf16 %v332_v44, %v331_v43  ;;  %v316_v54 = vld [vmem:[%s2029_s21 + $0x108] sm:$0xff]  ;;  %v411_v57 = vpack.c.bf16 %v284_v52, %v283_v51  ;;  %v378_v60 = vld [vmem:[%s2029_s21 + $0x2f8] sm:$0xff]  ;;  %v361_v6 = vld [vmem:[%s2029_s21 + $0x270] sm:$0xff] }
  0x33   : > { %v427_v58 = vpack.c.bf16 %v316_v54, %v315_v53  ;;  %v458_v3 = vpack.c.bf16 %v378_v60, %v377_v59  ;;  %v362_v7 = vld [vmem:[%s2029_s21 + $0x278] sm:$0xff]  ;;  %v393_v8 = vld [vmem:[%s2029_s21 + $0x370] sm:$0xff]  ;;  %v982_v11 = vld [vmem:[%s2575_s4 + $0x20] sm:$0xff] }
  0x34   : > { %991 = vperm.xlu1 %1854, %v979_v45   ;;  %v521_v2 = vsel %vm513_vm0, %v411_v57, 0  ;;  %v394_v9 = vld [vmem:[%s2029_s21 + $0x378] sm:$0xff]  ;;  %v1341_v10 = vld [vmem:[%s2576_s5 + $0x10] sm:$0xff]  ;;  %v407_v17 = vld [vmem:[%s2029_s21 + $0x3e0] sm:$0xff] }
  0x35   : > { %v569_v4 = vsel %vm513_vm0, %v427_v58, 0  ;;  %v1342_v16 = vld [vmem:[%s2576_s5 + $0x18] sm:$0xff]  ;;  %v408_v18 = vld [vmem:[%s2029_s21 + $0x3e8] sm:$0xff]  ;;  %v359_v24 = vld [vmem:[%s2029_s21 + $0x260] sm:$0xff] }
  0x36   : > { %986 = vperm.xlu0 %1853, %v978_v46   ;;  %v983_v19 = vld [vmem:[%s2575_s4 + $0x28] sm:$0xff]  ;;  %v373_v34 = vld [vmem:[%s2029_s21 + $0x2d0] sm:$0xff]  ;;  %v374_v35 = vld [vmem:[%s2029_s21 + $0x2d8] sm:$0xff] }
  0x37   : > { %v2189_v21 = vld [vmem:[%s2572_s1 + $0x8] sm:$0xff]   ;;  %v405_v36 = vld [vmem:[%s2029_s21 + $0x3d0] sm:$0xff]  ;;  %v406_v37 = vld [vmem:[%s2029_s21 + $0x3d8] sm:$0xff]  ;;  %v456_v40 = vpack.c.bf16 %v374_v35, %v373_v34 }
  0x38   : > { %1707 = vmatpush3.bf16.xpose.msra.mxu0 %v533_v61  ;;  %1001 = vperm.xlu1 %1854, %v981_v55   ;;  %v409_v61 = vld [vmem:[%s2029_s21 + $0x3f0] sm:$0xff]  ;;  %v360_v25 = vld [vmem:[%s2029_s21 + $0x268] sm:$0xff]  ;;  %v1511_v38 = vld [vmem:[#allocation2] sm:$0x1]  ;;  %v472_v42 = vpack.c.bf16 %v406_v37, %v405_v36 }
  0x39   : > { %1727 = vmatpush3.bf16.xpose.msra.mxu1 %v581_v63  ;;  %1784 = vmatprep.subr.msk.bf16.mxu0 %vm513_vm0, %v422_v62  ;;  %v410_v62 = vld [vmem:[%s2029_s21 + $0x3f8] sm:$0xff]  ;;  %v1340_v63 = vld [vmem:[%s2576_s5 + $0x8] sm:$0xff]  ;;  %v357_v43 = vld [vmem:[%s2029_s21 + $0x250] sm:$0xff] }
  0x3a   : > { %1792 = vmatprep.subr.msk.bf16.mxu1 %vm513_vm0, %v438_v0  ;;  %996 = vperm.xlu0 %1853, %v980_v56   ;;  %v1339_v0 = vld [vmem:[%s2576_s5] sm:$0xff]  ;;  %v474_v5 = vpack.c.bf16 %v410_v62, %v409_v61  ;;  %v392_v28 = vld [vmem:[%s2029_s21 + $0x368] sm:$0xff]  ;;  %v358_v44 = vld [vmem:[%s2029_s21 + $0x258] sm:$0xff] }
  0x3b   : > { %v1344_v32 = vld [vmem:[%s2576_s5 + $0x28] sm:$0xff]  ;;  %v389_v45 = vld [vmem:[%s2029_s21 + $0x350] sm:$0xff]  ;;  %v390_v46 = vld [vmem:[%s2029_s21 + $0x358] sm:$0xff] }
  0x3c   : > { %1352 = vperm.xlu1 %1854, %v1340_v63   ;;  %v403_v51 = vld [vmem:[%s2029_s21 + $0x3c0] sm:$0xff]  ;;  %v404_v52 = vld [vmem:[%s2029_s21 + $0x3c8] sm:$0xff]  ;;  %v369_v63 = vld [vmem:[%s2029_s21 + $0x2b0] sm:$0xff] }
  0x3d   : > { %v471_v56 = vpack.c.bf16 %v404_v52, %v403_v51  ;;  %v355_v57 = vld [vmem:[%s2029_s21 + $0x240] sm:$0xff]  ;;  %v356_v58 = vld [vmem:[%s2029_s21 + $0x248] sm:$0xff] }
  0x3e   : > { %1347 = vperm.xlu0 %1853, %v1339_v0   ;;  %v387_v59 = vld [vmem:[%s2029_s21 + $0x340] sm:$0xff]  ;;  %v388_v60 = vld [vmem:[%s2029_s21 + $0x348] sm:$0xff]  ;;  %v447_v61 = vpack.c.bf16 %v356_v58, %v355_v57  ;;  %v370_v0 = vld [vmem:[%s2029_s21 + $0x2b8] sm:$0xff] }
  0x3f   : > { %v463_v62 = vpack.c.bf16 %v388_v60, %v387_v59  ;;  %v347_v52 = vld [vmem:[%s2029_s21 + $0x200] sm:$0xff] }
  0x40   : > { %1709 = vmatpush3.bf16.xpose.msra.mxu0 %v530_v12  ;;  %v450_v12 = vpack.c.bf16 %v362_v7, %v361_v6  ;;  %1357 = vperm.xlu1 %1854, %v1341_v10   ;;  %v385_v10 = vld [vmem:[%s2029_s21 + $0x330] sm:$0xff] }
  0x41   : > { %1729 = vmatpush3.bf16.xpose.msra.mxu1 %v578_v14  ;;  %1785 = vmatprep.subr.msk.bf16.mxu0 %vm513_vm0, %v421_v13  ;;  %v466_v13 = vpack.c.bf16 %v394_v9, %v393_v8  ;;  %v375_v14 = vld [vmem:[%s2029_s21 + $0x2e0] sm:$0xff]  ;;  %v677_v6 = vsel %vm513_vm0, %v463_v62, 0  ;;  %v353_v8 = vld [vmem:[%s2029_s21 + $0x230] sm:$0xff]  ;;  %v354_v9 = vld [vmem:[%s2029_s21 + $0x238] sm:$0xff] }
  0x42   : > { %1793 = vmatprep.subr.msk.bf16.mxu1 %vm513_vm0, %v437_v15  ;;  %v376_v15 = vld [vmem:[%s2029_s21 + $0x2e8] sm:$0xff]  ;;  %1006 = vperm.xlu0 %1853, %v982_v11   ;;  %v638_v20 = vsel %vm513_vm0, %v450_v12, 0  ;;  %v386_v11 = vld [vmem:[%s2029_s21 + $0x338] sm:$0xff]  ;;  %v446_v12 = vpack.c.bf16 %v354_v9, %v353_v8 }
  0x43   : > { %v686_v22 = vsel %vm513_vm0, %v466_v13, 0  ;;  %v457_v23 = vpack.c.bf16 %v376_v15, %v375_v14  ;;  %v462_v13 = vpack.c.bf16 %v386_v11, %v385_v10  ;;  %v367_v14 = vld [vmem:[%s2029_s21 + $0x2a0] sm:$0xff]  ;;  %v368_v15 = vld [vmem:[%s2029_s21 + $0x2a8] sm:$0xff] }
  0x44   : > { %1362 = vperm.xlu1 %1854, %v1342_v16   ;;  %v399_v16 = vld [vmem:[%s2029_s21 + $0x3a0] sm:$0xff] }
  0x46   : > { %1011 = vperm.xlu0 %1853, %v983_v19   ;;  %v453_v19 = vpack.c.bf16 %v368_v15, %v367_v14 }
  0x48   : > { %1711 = vmatpush3.bf16.xpose.msra.mxu0 %v527_v26  ;;  %v473_v26 = vpack.c.bf16 %v408_v18, %v407_v17  ;;  %1372 = vperm.xlu1 %1854, %v1344_v32   ;;  %v400_v17 = vld [vmem:[%s2029_s21 + $0x3a8] sm:$0xff]  ;;  %v626_v18 = vsel %vm513_vm0, %v446_v12, 0  ;;  %v397_v32 = vld [vmem:[%s2029_s21 + $0x390] sm:$0xff] }
  0x49   : > { %1731 = vmatpush3.bf16.xpose.msra.mxu1 %v575_v29  ;;  %1786 = vmatprep.subr.msk.bf16.mxu0 %vm513_vm0, %v420_v27  ;;  %v391_v27 = vld [vmem:[%s2029_s21 + $0x360] sm:$0xff] }
  0x4a   : > { %1794 = vmatprep.subr.msk.bf16.mxu1 %vm513_vm0, %v436_v31  ;;  %v1343_v29 = vld [vmem:[%s2576_s5 + $0x20] sm:$0xff]  ;;  %v449_v31 = vpack.c.bf16 %v360_v25, %v359_v24  ;;  %v465_v33 = vpack.c.bf16 %v392_v28, %v391_v27  ;;  %v352_v24 = vld [vmem:[%s2029_s21 + $0x228] sm:$0xff] }
  0x4b   : > { %1367 = vperm.xlu0 %1853, %v1343_v29   ;;  %v383_v25 = vld [vmem:[%s2029_s21 + $0x320] sm:$0xff]  ;;  %v365_v29 = vld [vmem:[%s2029_s21 + $0x290] sm:$0xff] }
  0x4c   : > { %v635_v39 = vsel %vm513_vm0, %v449_v31, 0  ;;  %v683_v41 = vsel %vm513_vm0, %v465_v33, 0  ;;  %v366_v31 = vld [vmem:[%s2029_s21 + $0x298] sm:$0xff] }
  0x4d   : > { %v398_v33 = vld [vmem:[%s2029_s21 + $0x398] sm:$0xff]  ;;  %v452_v35 = vpack.c.bf16 %v366_v31, %v365_v29 }
  0x4e   : > { %v468_v37 = vpack.c.bf16 %v398_v33, %v397_v32 }
  0x4f   : > { %1514 = vperm.xlu0 %1853, %v1511_v38   ;;  %v349_v38 = vld [vmem:[%s2029_s21 + $0x210] sm:$0xff] }
  0x50   : > { %1713 = vmatpush3.bf16.xpose.msra.mxu0 %v524_v47  ;;  %v448_v47 = vpack.c.bf16 %v358_v44, %v357_v43  ;;  %v363_v44 = vld [vmem:[%s2029_s21 + $0x280] sm:$0xff] }
  0x51   : > { %1733 = vmatpush3.bf16.xpose.msra.mxu1 %v572_v49  ;;  %1787 = vmatprep.subr.msk.bf16.mxu0 %vm513_vm0, %v419_v48  ;;  %v464_v48 = vpack.c.bf16 %v390_v46, %v389_v45  ;;  %v371_v49 = vld [vmem:[%s2029_s21 + $0x2c0] sm:$0xff]  ;;  %v364_v45 = vld [vmem:[%s2029_s21 + $0x288] sm:$0xff] }
  0x52   : > { %1795 = vmatprep.subr.msk.bf16.mxu1 %vm513_vm0, %v435_v50  ;;  %v372_v50 = vld [vmem:[%s2029_s21 + $0x2c8] sm:$0xff]  ;;  %v632_v53 = vsel %vm513_vm0, %v448_v47, 0  ;;  %v395_v46 = vld [vmem:[%s2029_s21 + $0x380] sm:$0xff] }
  0x53   : > { %v455_v54 = vpack.c.bf16 %v372_v50, %v371_v49  ;;  %v680_v55 = vsel %vm513_vm0, %v464_v48, 0  ;;  %v396_v47 = vld [vmem:[%s2029_s21 + $0x388] sm:$0xff]  ;;  %v451_v49 = vpack.c.bf16 %v364_v45, %v363_v44 }
  0x54   : > { %v467_v51 = vpack.c.bf16 %v396_v47, %v395_v46 }
  0x58   : > { %1715 = vmatpush3.bf16.xpose.msra.mxu0 %v521_v2  ;;  %v401_v2 = vld [vmem:[%s2029_s21 + $0x3b0] sm:$0xff] }
  0x59   : > { %1735 = vmatpush3.bf16.xpose.msra.mxu1 %v569_v4  ;;  %1796 = vmatprep.subr.msk.bf16.mxu0 %vm513_vm0, %v458_v3  ;;  %v402_v3 = vld [vmem:[%s2029_s21 + $0x3b8] sm:$0xff]  ;;  %v629_v4 = vsel %vm513_vm0, %v447_v61, 0 }
  0x5a   : > { %1804 = vmatprep.subr.msk.bf16.mxu1 %vm513_vm0, %v474_v5  ;;  %v454_v5 = vpack.c.bf16 %v370_v0, %v369_v63  ;;  %v470_v7 = vpack.c.bf16 %v402_v3, %v401_v2 }
  0x5f   : > { %1717 = vmatmul.mubr.msk.bf16.vlgmr.msra.gmra.mxu0 %vm513_vm0, %v2019_v1 }
  0x60   : > { %1737 = vmatmul.mubr.msk.bf16.vlgmr.msra.gmra.mxu1 %vm513_vm0, %v2019_v1  ;;  %1741 = vmatpush3.bf16.xpose.msra.mxu0 %v638_v20  ;;  %v674_v20 = vsel %vm513_vm0, %v462_v13, 0 }
  0x61   : > { %1761 = vmatpush3.bf16.xpose.msra.mxu1 %v686_v22  ;;  %1718 = vmatprep.mubr.msk.bf16.mxu0 %vm513_vm0, %v2189_v21  ;;  %v469_v22 = vpack.c.bf16 %v400_v17, %v399_v16 }
  0x62   : > { %1738 = vmatprep.mubr.msk.bf16.mxu1 %vm513_vm0, %v2189_v21  ;;  %1797 = vmatprep.subr.msk.bf16.mxu0 %vm513_vm0, %v457_v23  ;;  %v351_v23 = vld [vmem:[%s2029_s21 + $0x220] sm:$0xff] }
  0x63   : > { %1805 = vmatprep.subr.msk.bf16.mxu1 %vm513_vm0, %v473_v26  ;;  %v384_v26 = vld [vmem:[%s2029_s21 + $0x328] sm:$0xff]  ;;  %v445_v27 = vpack.c.bf16 %v352_v24, %v351_v23 }
  0x64   : > { %v461_v28 = vpack.c.bf16 %v384_v26, %v383_v25 }
  0x65   : > { %v623_v34 = vsel %vm513_vm0, %v445_v27, 0 }
  0x66   : > { %v671_v36 = vsel %vm513_vm0, %v461_v28, 0 }
  0x67   : > { %1719 = vmatmul.mubr.msk.bf16.gmra.mxu0 %vm513_vm0, %v2189_v21 }
  0x68   : > { %1739 = vmatmul.mubr.msk.bf16.gmra.mxu1 %vm513_vm0, %v2189_v21  ;;  %1743 = vmatpush3.bf16.xpose.msra.mxu0 %v635_v39  ;;  %v350_v39 = vld [vmem:[%s2029_s21 + $0x218] sm:$0xff] }
  0x69   : > { %1763 = vmatpush3.bf16.xpose.msra.mxu1 %v683_v41  ;;  %1798 = vmatprep.subr.msk.bf16.mxu0 %vm513_vm0, %v456_v40  ;;  %v381_v40 = vld [vmem:[%s2029_s21 + $0x310] sm:$0xff]  ;;  %v382_v41 = vld [vmem:[%s2029_s21 + $0x318] sm:$0xff] }
  0x6a   : > { %1806 = vmatprep.subr.msk.bf16.mxu1 %vm513_vm0, %v472_v42  ;;  %1756 = vmatprep.mubr.msk.bf16.mxu0 %vm513_vm0, %v2019_v1  ;;  %v444_v42 = vpack.c.bf16 %v350_v39, %v349_v38  ;;  %v460_v43 = vpack.c.bf16 %v382_v41, %v381_v40 }
  0x6b   : > { %1776 = vmatprep.mubr.msk.bf16.mxu1 %vm513_vm0, %v2019_v1 }
  0x6c   : > { %v620_v48 = vsel %vm513_vm0, %v444_v42, 0  ;;  %v668_v50 = vsel %vm513_vm0, %v460_v43, 0 }
  0x70   : > { %1745 = vmatpush3.bf16.xpose.msra.mxu0 %v632_v53  ;;  %v348_v53 = vld [vmem:[%s2029_s21 + $0x208] sm:$0xff] }
  0x71   : > { %1765 = vmatpush3.bf16.xpose.msra.mxu1 %v680_v55  ;;  %1799 = vmatprep.subr.msk.bf16.mxu0 %vm513_vm0, %v455_v54  ;;  %v379_v54 = vld [vmem:[%s2029_s21 + $0x300] sm:$0xff]  ;;  %v380_v55 = vld [vmem:[%s2029_s21 + $0x308] sm:$0xff]  ;;  %s1924_s21 = smov [#allocation3]  }
  0x72   : > { %1807 = vmatprep.subr.msk.bf16.mxu1 %vm513_vm0, %v471_v56  ;;  %v443_v56 = vpack.c.bf16 %v348_v53, %v347_v52  ;;  %v459_v57 = vpack.c.bf16 %v380_v55, %v379_v54  ;;  %s1864_s9 = sshll.u32 %s1924_s21, 4  ;;  %s1865_s9 = int_to_ptr.vmem [resolvable:$false] %s1864_s9 }
  0x73   : > { %s1866_s10 = scalar_lea.vmem %s1865_s9, 256  ;;  %p1867_p0 = scmp.lt.s32.totalorder %s1604_s22, %s1865_s9 }
  0x74   : > { %v617_v58 = vsel %vm513_vm0, %v443_v56, 0  ;;  %v665_v59 = vsel %vm513_vm0, %v459_v57, 0  ;;  %v2335_v57 = vld [vmem:[%s2574_s3] sm:$0xff]   ;;  %p1868_p1 = scmp.lt.s32.totalorder %s1866_s10, %s1860_s30 }
  0x76   : > { %p1869_p2 = por %p1868_p1, %p1867_p0 }
  0x78   : > { %1747 = vmatpush3.bf16.xpose.msra.mxu0 %v629_v4  ;;  %p1870_p3 = pnand %p1869_p2, %p1863_p13 }
  0x79   : > { %1767 = vmatpush3.bf16.xpose.msra.mxu1 %v677_v6  ;;  %1800 = vmatprep.subr.msk.bf16.mxu0 %vm513_vm0, %v454_v5 }
  0x7a   : > { %1808 = vmatprep.subr.msk.bf16.mxu1 %vm513_vm0, %v470_v7 }
  0x80   : > { %1749 = vmatpush3.bf16.xpose.msra.mxu0 %v626_v18 }
  0x81   : > { %1769 = vmatpush3.bf16.xpose.msra.mxu1 %v674_v20  ;;  %1801 = vmatprep.subr.msk.bf16.mxu0 %vm513_vm0, %v453_v19 }
  0x82   : > { %1809 = vmatprep.subr.msk.bf16.mxu1 %vm513_vm0, %v469_v22 }
  0x88   : > { %1751 = vmatpush3.bf16.xpose.msra.mxu0 %v623_v34 }
  0x89   : > { %1771 = vmatpush3.bf16.xpose.msra.mxu1 %v671_v36  ;;  %1802 = vmatprep.subr.msk.bf16.mxu0 %vm513_vm0, %v452_v35 }
  0x8a   : > { %1810 = vmatprep.subr.msk.bf16.mxu1 %vm513_vm0, %v468_v37 }
  0x90   : > { %1753 = vmatpush3.bf16.xpose.msra.mxu0 %v620_v48 }
  0x91   : > { %1773 = vmatpush3.bf16.xpose.msra.mxu1 %v668_v50  ;;  %1803 = vmatprep.subr.msk.bf16.mxu0 %vm513_vm0, %v451_v49 }
  0x92   : > { %1811 = vmatprep.subr.msk.bf16.mxu1 %vm513_vm0, %v467_v51 }
  0x98   : > { %1755 = vmatpush3.bf16.xpose.msra.mxu0 %v617_v58  ;;  %v2346_v58 = vld [vmem:[%s2574_s3 + $0x8] sm:$0xff]  }
  0x99   : > { %1775 = vmatpush3.bf16.xpose.msra.mxu1 %v665_v59  ;;  %v2357_v59 = vld [vmem:[%s2574_s3 + $0x10] sm:$0xff]  }
  0x9f   : > { %1757 = vmatmul.mubr.msk.bf16.vlgmr.msra.gmra.mxu0 %vm513_vm0, %v2019_v1 }
  0xa0   : > { %1777 = vmatmul.mubr.msk.bf16.vlgmr.msra.gmra.mxu1 %vm513_vm0, %v2019_v1  ;;  %1758 = vmatprep.mubr.msk.bf16.mxu0 %vm513_vm0, %v2189_v21 }
  0xa1   : > { %1778 = vmatprep.mubr.msk.bf16.mxu1 %vm513_vm0, %v2189_v21 }
  0xa7   : > { %1759 = vmatmul.mubr.msk.bf16.gmra.mxu0 %vm513_vm0, %v2189_v21  ;;  %v2310_v3 = vpop.permute.xlu1 %485 }
  0xa8   : > { %1779 = vmatmul.mubr.msk.bf16.gmra.mxu1 %vm513_vm0, %v2189_v21  ;;  %1071 = vmatprep.mubr.bf16.mxu0 %v1922_v30  ;;  %v2308_v0 = vpop.permute.xlu0 %495 }
  0xa9   : > { %1134 = vmatprep.mubr.bf16.mxu1 %v1922_v30 }
  0xab   : > { %v2317_v13 = vpop.permute.xlu1 %490 }
  0xad   : > { %v2312_v21 = vpop.permute.xlu0 %500 }
 0x11f   : > { %v746_v60 = vpop.f32.mrf.mxu0 }
 0x120   : > { %v799_v61 = vpop.f32.mrf.mxu1  ;;  %v747_v39 = vadd.f32 %v746_v60, %v2310_v3 }
 0x121   : > { %v748_v62 = vpop.f32.mrf.mxu0  ;;  %v800_v43 = vadd.f32 %v799_v61, %v2310_v3 }
 0x122   : > { %v801_v1 = vpop.f32.mrf.mxu1  ;;  %v749_v16 = vadd.f32 %v748_v62, %v2310_v3  ;;  %v924_v52 = vmax.f32 %v747_v39, 0.0 }
 0x123   : > { %v750_v63 = vpop.f32.mrf.mxu0  ;;  %v802_v20 = vadd.f32 %v801_v1, %v2310_v3  ;;  %v926_v54 = vmax.f32 %v800_v43, 0.0 }
 0x124   : > { %v803_v2 = vpop.f32.mrf.mxu1  ;;  %v751_v32 = vadd.f32 %v750_v63, %v2317_v13  ;;  %v925_v44 = vmax.f32 %v749_v16, 0.0 }
 0x125   : > { %v752_v4 = vpop.f32.mrf.mxu0  ;;  %v804_v36 = vadd.f32 %v803_v2, %v2317_v13  ;;  %v927_v47 = vmax.f32 %v802_v20, 0.0 }
 0x126   : > { %v805_v5 = vpop.f32.mrf.mxu1  ;;  %v753_v17 = vadd.f32 %v752_v4, %v2317_v13  ;;  %v932_v48 = vmax.f32 %v751_v32, 0.0 }
 0x127   : > { %v756_v6 = vpop.f32.mrf.mxu0  ;;  %v806_v22 = vadd.f32 %v805_v5, %v2317_v13  ;;  %v934_v50 = vmax.f32 %v804_v36, 0.0 }
 0x128   : > { %v809_v7 = vpop.f32.mrf.mxu1  ;;  %v757_v9 = vadd.f32 %v756_v6, %v2308_v0  ;;  %v933_v37 = vmax.f32 %v753_v17, 0.0  ;;  %v962_v55 = vpack.c.bf16 %v932_v48, %v924_v52 }
 0x129   : > { %v758_v8 = vpop.f32.mrf.mxu0  ;;  %v810_v12 = vadd.f32 %v809_v7, %v2308_v0  ;;  %v935_v40 = vmax.f32 %v806_v22, 0.0  ;;  %v964_v56 = vpack.c.bf16 %v934_v50, %v926_v54 }
 0x12a   : > { %v759_v10 = vadd.f32 %v758_v8, %v2308_v0  ;;  %v811_v11 = vpop.f32.mrf.mxu1  ;;  %v940_v24 = vmax.f32 %v757_v9, 0.0  ;;  %v963_v51 = vpack.c.bf16 %v933_v37, %v925_v44 }
 0x12b   : > { %v812_v14 = vadd.f32 %v811_v11, %v2308_v0  ;;  %v760_v15 = vpop.f32.mrf.mxu0  ;;  %v942_v31 = vmax.f32 %v810_v12, 0.0  ;;  %v965_v53 = vpack.c.bf16 %v935_v40, %v927_v47 }
 0x12c   : > { %v813_v18 = vpop.f32.mrf.mxu1  ;;  %v761_v19 = vadd.f32 %v760_v15, %v2312_v21  ;;  %v941_v26 = vmax.f32 %v759_v10, 0.0 }
 0x12d   : > { %v762_v23 = vpop.f32.mrf.mxu0  ;;  %v814_v25 = vadd.f32 %v813_v18, %v2312_v21  ;;  %v943_v33 = vmax.f32 %v812_v14, 0.0 }
 0x12e   : > { %v763_v27 = vadd.f32 %v762_v23, %v2312_v21  ;;  %v815_v28 = vpop.f32.mrf.mxu1  ;;  %v948_v29 = vmax.f32 %v761_v19, 0.0 }
 0x12f   : > { %v816_v34 = vadd.f32 %v815_v28, %v2312_v21  ;;  %v950_v35 = vmax.f32 %v814_v25, 0.0 }
 0x130   : > { %v949_v38 = vmax.f32 %v763_v27, 0.0  ;;  %v970_v42 = vpack.c.bf16 %v948_v29, %v940_v24 }
 0x131   : > { %v951_v41 = vmax.f32 %v816_v34, 0.0  ;;  %v972_v46 = vpack.c.bf16 %v950_v35, %v942_v31 }
 0x132   : > { %v971_v45 = vpack.c.bf16 %v949_v38, %v941_v26 }
 0x133   : > { %v973_v49 = vpack.c.bf16 %v951_v41, %v943_v33 }
 0x134   : > { %1051 = vmatprep.subr.bf16.mxu0 %v971_v45 }
 0x135   : > { %1114 = vmatprep.subr.bf16.mxu1 %v973_v49  ;;  %1052 = vmatpush1.bf16.msra.mxu0 %v970_v42 }
 0x136   : > { %1115 = vmatpush1.bf16.msra.mxu1 %v972_v46  ;;  %1053 = vmatprep.subr.bf16.mxu0 %v963_v51 }
 0x137   : > { %1116 = vmatprep.subr.bf16.mxu1 %v965_v53 }
 0x139   : > { %1054 = vmatpush1.bf16.msra.mxu0 %v962_v55 }
 0x13a   : > { %1117 = vmatpush1.bf16.msra.mxu1 %v964_v56 }
 0x13c   : > { %1682 = vmatmul.mubr.msk.bf16.vlgmr.msra.gmra.mxu0 %vm1029_vm1, %v2335_v57 }
 0x13d   : > { %1685 = vmatmul.mubr.msk.bf16.vlgmr.msra.gmra.mxu1 %vm1029_vm1, %v2335_v57  ;;  %1081 = vmatprep.mubr.bf16.mxu0 %v1922_v30 }
 0x13e   : > { %1144 = vmatprep.mubr.bf16.mxu1 %v1922_v30 }
 0x144   : > { %1683 = vmatmul.mubr.msk.bf16.gmra.mxu0 %vm1029_vm1, %v2346_v58 }
 0x145   : > { %1686 = vmatmul.mubr.msk.bf16.gmra.mxu1 %vm1029_vm1, %v2346_v58  ;;  %1091 = vmatprep.mubr.bf16.mxu0 %v1922_v30 }
 0x146   : > { %1154 = vmatprep.mubr.bf16.mxu1 %v1922_v30 }
 0x14c   : > { %1684 = vmatmul.mubr.msk.bf16.gmra.mxu0 %vm1029_vm1, %v2357_v59 }
 0x14d   : > { %1687 = vmatmul.mubr.msk.bf16.gmra.mxu1 %vm1029_vm1, %v2357_v59  ;;  %1197 = vmatprep.mubr.bf16.mxu0 %v1922_v30 }
 0x14e   : > { %1260 = vmatprep.mubr.bf16.mxu1 %v1922_v30 }
 0x15f   : > { %v852_v60 = vpop.f32.mrf.mxu0 }
 0x160   : > { %v905_v61 = vpop.f32.mrf.mxu1  ;;  %v853_v11 = vadd.f32 %v852_v60, %v2310_v3 }
 0x161   : > { %v854_v62 = vpop.f32.mrf.mxu0 }
 0x162   : > { %v907_v1 = vpop.f32.mrf.mxu1  ;;  %v855_v23 = vadd.f32 %v854_v62, %v2310_v3  ;;  %v928_v49 = vmax.f32 %v853_v11, 0.0 }
 0x163   : > { %v856_v63 = vpop.f32.mrf.mxu0  ;;  %v908_v24 = vadd.f32 %v907_v1, %v2310_v3 }
 0x164   : > { %v909_v2 = vpop.f32.mrf.mxu1  ;;  %v857_v28 = vadd.f32 %v856_v63, %v2317_v13  ;;  %v929_v41 = vmax.f32 %v855_v23, 0.0  ;;  %v2397_v63 = vpop.permute.xlu0 %986 }
 0x165   : > { %v858_v4 = vpop.f32.mrf.mxu0  ;;  %v910_v29 = vadd.f32 %v909_v2, %v2317_v13  ;;  %v931_v44 = vmax.f32 %v908_v24, 0.0 }
 0x166   : > { %v911_v5 = vpop.f32.mrf.mxu1  ;;  %v859_v12 = vadd.f32 %v858_v4, %v2317_v13  ;;  %v936_v45 = vmax.f32 %v857_v28, 0.0  ;;  %v2399_v4 = vpop.permute.xlu1 %991 }
 0x167   : > { %v862_v6 = vpop.f32.mrf.mxu0  ;;  %v912_v17 = vadd.f32 %v911_v5, %v2317_v13  ;;  %v938_v47 = vmax.f32 %v910_v29, 0.0 }
 0x168   : > { %v915_v7 = vpop.f32.mrf.mxu1  ;;  %v863_v18 = vadd.f32 %v862_v6, %v2308_v0  ;;  %v937_v33 = vmax.f32 %v859_v12, 0.0  ;;  %v966_v52 = vpack.c.bf16 %v936_v45, %v928_v49 }
 0x169   : > { %v864_v8 = vpop.f32.mrf.mxu0  ;;  %v916_v25 = vadd.f32 %v915_v7, %v2308_v0  ;;  %v939_v37 = vmax.f32 %v912_v17, 0.0  ;;  %v2401_v7 = vpop.permute.xlu0 %996 }
 0x16a   : > { %v917_v9 = vpop.f32.mrf.mxu1  ;;  %v865_v14 = vadd.f32 %v864_v8, %v2308_v0  ;;  %v944_v38 = vmax.f32 %v863_v18, 0.0  ;;  %v967_v48 = vpack.c.bf16 %v937_v33, %v929_v41 }
 0x16b   : > { %v866_v10 = vpop.f32.mrf.mxu0  ;;  %v918_v19 = vadd.f32 %v917_v9, %v2308_v0  ;;  %v906_v0 = vadd.f32 %v905_v61, %v2310_v3  ;;  %v946_v42 = vmax.f32 %v916_v25, 0.0  ;;  %v969_v50 = vpack.c.bf16 %v939_v37, %v931_v44 }
 0x16c   : > { %v867_v15 = vadd.f32 %v866_v10, %v2312_v21  ;;  %v919_v16 = vpop.f32.mrf.mxu1  ;;  %v945_v34 = vmax.f32 %v865_v14, 0.0 }
 0x16d   : > { %v920_v20 = vadd.f32 %v919_v16, %v2312_v21  ;;  %v868_v22 = vpop.f32.mrf.mxu0  ;;  %v947_v39 = vmax.f32 %v918_v19, 0.0  ;;  %v930_v51 = vmax.f32 %v906_v0, 0.0  ;;  %v2407_v12 = vpop.permute.xlu0 %1347 }
 0x16e   : > { %v869_v26 = vadd.f32 %v868_v22, %v2312_v21  ;;  %v921_v27 = vpop.f32.mrf.mxu1  ;;  %v952_v31 = vmax.f32 %v867_v15, 0.0 }
 0x16f   : > { %v922_v32 = vadd.f32 %v921_v27, %v2312_v21  ;;  %v954_v35 = vmax.f32 %v920_v20, 0.0  ;;  %v968_v3 = vpack.c.bf16 %v938_v47, %v930_v51 }
 0x170   : > { %v953_v36 = vmax.f32 %v869_v26, 0.0  ;;  %v974_v46 = vpack.c.bf16 %v952_v31, %v944_v38 }
 0x171   : > { %v955_v40 = vmax.f32 %v922_v32, 0.0  ;;  %v976_v21 = vpack.c.bf16 %v954_v35, %v946_v42  ;;  %v2418_v33 = vpop.permute.xlu0 %1006 }
 0x172   : > { %v975_v43 = vpack.c.bf16 %v953_v36, %v945_v34 }
 0x173   : > { %v977_v13 = vpack.c.bf16 %v955_v40, %v947_v39 }
 0x174   : > { %1177 = vmatprep.subr.bf16.mxu0 %v975_v43 }
 0x175   : > { %1240 = vmatprep.subr.bf16.mxu1 %v977_v13  ;;  %1178 = vmatpush1.bf16.msra.mxu0 %v974_v46 }
 0x176   : > { %1241 = vmatpush1.bf16.msra.mxu1 %v976_v21  ;;  %1179 = vmatprep.subr.bf16.mxu0 %v967_v48 }
 0x177   : > { %1242 = vmatprep.subr.bf16.mxu1 %v969_v50 }
 0x179   : > { %1180 = vmatpush1.bf16.msra.mxu0 %v966_v52 }
 0x17a   : > { %1243 = vmatpush1.bf16.msra.mxu1 %v968_v3 }
 0x17c   : > { %1688 = vmatmul.mubr.msk.bf16.vlgmr.msra.gmra.mxu0 %vm1029_vm1, %v2335_v57 }
 0x17d   : > { %1691 = vmatmul.mubr.msk.bf16.vlgmr.msra.gmra.mxu1 %vm1029_vm1, %v2335_v57  ;;  %1207 = vmatprep.mubr.bf16.mxu0 %v1922_v30 }
 0x17e   : > { %1270 = vmatprep.mubr.bf16.mxu1 %v1922_v30 }
 0x184   : > { %1689 = vmatmul.mubr.msk.bf16.gmra.mxu0 %vm1029_vm1, %v2346_v58 }
 0x185   : > { %1692 = vmatmul.mubr.msk.bf16.gmra.mxu1 %vm1029_vm1, %v2346_v58  ;;  %1217 = vmatprep.mubr.bf16.mxu0 %v1922_v30 }
 0x186   : > { %1280 = vmatprep.mubr.bf16.mxu1 %v1922_v30 }
 0x18c   : > { %1690 = vmatmul.mubr.msk.bf16.gmra.mxu0 %vm1029_vm1, %v2357_v59 }
 0x18d   : > { %1693 = vmatmul.mubr.msk.bf16.gmra.mxu1 %vm1029_vm1, %v2357_v59  ;;  %v2403_v59 = vpop.permute.xlu1 %1001 }
 0x191   : > { %v2412_v19 = vpop.permute.xlu1 %1352 }
 0x195   : > { %v2422_v39 = vpop.permute.xlu1 %1357 }
 0x1fc   : > { %v1073_v53 = vpop.f32.mrf.mxu0 }
 0x1fd   : > { %v1136_v54 = vpop.f32.mrf.mxu1  ;;  %v1074_v14 = vadd.f32 %v1073_v53, %v2397_v63  ;;  %v2436_v53 = vpop.permute.xlu0 %1011 }
 0x1fe   : > { %v1075_v55 = vpop.f32.mrf.mxu0  ;;  %v1137_v16 = vadd.f32 %v1136_v54, %v2397_v63 }
 0x1ff   : > { %v1138_v56 = vpop.f32.mrf.mxu1  ;;  %v1076_v20 = vadd.f32 %v1075_v55, %v2397_v63  ;;  %v1291_v26 = vmax.f32 %v1074_v14, 0.0 }
 0x200   : > { %v1077_v57 = vpop.f32.mrf.mxu0  ;;  %v1139_v22 = vadd.f32 %v1138_v56, %v2397_v63  ;;  %v1293_v28 = vmax.f32 %v1137_v16, 0.0 }
 0x201   : > { %v1140_v60 = vpop.f32.mrf.mxu1  ;;  %v1078_v10 = vadd.f32 %v1077_v57, %v2399_v4  ;;  %v1292_v34 = vmax.f32 %v1076_v20, 0.0  ;;  %v1375_v40 = vmul.f32 %v2407_v12, %v1291_v26 }
 0x202   : > { %v1079_v61 = vpop.f32.mrf.mxu0  ;;  %v1141_v11 = vadd.f32 %v1140_v60, %v2399_v4  ;;  %v1294_v35 = vmax.f32 %v1139_v22, 0.0  ;;  %v1377_v42 = vmul.f32 %v2407_v12, %v1293_v28 }
 0x203   : > { %v1142_v62 = vpop.f32.mrf.mxu1  ;;  %v1080_v15 = vadd.f32 %v1079_v61, %v2399_v4  ;;  %v1299_v23 = vmax.f32 %v1078_v10, 0.0  ;;  %v1376_v47 = vmul.f32 %v2407_v12, %v1292_v34  ;;  %v2445_v10 = vpop.permute.xlu1 %1362 }
 0x204   : > { %v1083_v1 = vpop.f32.mrf.mxu0  ;;  %v1301_v24 = vmax.f32 %v1141_v11, 0.0  ;;  %v1143_v25 = vadd.f32 %v1142_v62, %v2399_v4  ;;  %v1378_v48 = vmul.f32 %v2407_v12, %v1294_v35 }
 0x205   : > { %v1146_v58 = vpop.f32.mrf.mxu1  ;;  %v1300_v27 = vmax.f32 %v1080_v15, 0.0  ;;  %v1084_v29 = vadd.f32 %v1083_v1, %v2401_v7  ;;  %v1383_v36 = vmul.f32 %v2412_v19, %v1299_v23 }
 0x206   : > { %v1085_v2 = vpop.f32.mrf.mxu0  ;;  %v1385_v37 = vmul.f32 %v2412_v19, %v1301_v24  ;;  %v1302_v38 = vmax.f32 %v1143_v25, 0.0  ;;  %v1147_v41 = vadd.f32 %v1146_v58, %v2401_v7 }
 0x207   : > { %v1148_v30 = vpop.f32.mrf.mxu1  ;;  %v1384_v0 = vmul.f32 %v2412_v19, %v1300_v27  ;;  %v1307_v43 = vmax.f32 %v1084_v29, 0.0  ;;  %v1086_v44 = vadd.f32 %v1085_v2, %v2401_v7  ;;  %v1423_v21 = vadd.f32 %v1383_v36, %v1375_v40 }
 0x208   : > { %v1087_v5 = vpop.f32.mrf.mxu0  ;;  %v1149_v45 = vadd.f32 %v1148_v30, %v2401_v7  ;;  %v1445_v50 = vadd.f32 %v1385_v37, %v1377_v42  ;;  %v1386_v51 = vmul.f32 %v2412_v19, %v1302_v38  ;;  %v1309_v55 = vmax.f32 %v1147_v41, 0.0  ;;  %v2460_v41 = vpop.permute.xlu1 %1372 }
 0x209   : > { %v1150_v6 = vpop.f32.mrf.mxu1  ;;  %v1088_v49 = vadd.f32 %v1087_v5, %v2403_v59  ;;  %v1434_v54 = vadd.f32 %v1384_v0, %v1376_v47  ;;  %v1391_v60 = vmul.f32 %v2422_v39, %v1307_v43  ;;  %v1308_v61 = vmax.f32 %v1086_v44, 0.0 }
 0x20a   : > { %v1089_v8 = vpop.f32.mrf.mxu0  ;;  %v1151_v52 = vadd.f32 %v1150_v6, %v2403_v59  ;;  %v1310_v62 = vmax.f32 %v1149_v45, 0.0  ;;  %v1393_v22 = vmul.f32 %v2422_v39, %v1309_v55 }
 0x20b   : > { %v1152_v9 = vpop.f32.mrf.mxu1  ;;  %v1090_v3 = vadd.f32 %v1089_v8, %v2403_v59  ;;  %v1315_v30 = vmax.f32 %v1088_v49, 0.0  ;;  %v1392_v23 = vmul.f32 %v2422_v39, %v1308_v61 }
 0x20c   : > { %v1093_v17 = vpop.f32.mrf.mxu0  ;;  %v1153_v56 = vadd.f32 %v1152_v9, %v2403_v59  ;;  %v1456_v9 = vadd.f32 %v1386_v51, %v1378_v48  ;;  %v1317_v11 = vmax.f32 %v1151_v52, 0.0  ;;  %v1394_v24 = vmul.f32 %v2422_v39, %v1310_v62 }
 0x20d   : > { %v1156_v18 = vpop.f32.mrf.mxu1  ;;  %v1094_v57 = vadd.f32 %v1093_v17, %v2418_v33  ;;  %v1316_v14 = vmax.f32 %v1090_v3, 0.0  ;;  %v1399_v26 = vmul.f32 %v2445_v10, %v1315_v30  ;;  %v1446_v42 = vadd.f32 %v1445_v50, %v1393_v22 }
 0x20e   : > { %v1095_v31 = vpop.f32.mrf.mxu0  ;;  %v1157_v1 = vadd.f32 %v1156_v18, %v2418_v33  ;;  %v1318_v16 = vmax.f32 %v1153_v56, 0.0  ;;  %v1401_v34 = vmul.f32 %v2445_v10, %v1317_v11  ;;  %v1435_v43 = vadd.f32 %v1434_v54, %v1392_v23 }
 0x20f   : > { %v1158_v32 = vpop.f32.mrf.mxu1  ;;  %v1096_v5 = vadd.f32 %v1095_v31, %v2418_v33  ;;  %v1323_v17 = vmax.f32 %v1094_v57, 0.0  ;;  %v2454_v31 = vpop.permute.xlu0 %1367  ;;  %v1400_v35 = vmul.f32 %v2445_v10, %v1316_v14  ;;  %v1457_v44 = vadd.f32 %v1456_v9, %v1394_v24 }
 0x210   : > { %v1097_v46 = vpop.f32.mrf.mxu0  ;;  %v1159_v6 = vadd.f32 %v1158_v32, %v2418_v33  ;;  %v1325_v25 = vmax.f32 %v1157_v1, 0.0  ;;  %v1424_v32 = vadd.f32 %v1423_v21, %v1391_v60  ;;  %v1402_v37 = vmul.f32 %v2445_v10, %v1318_v16 }
 0x211   : > { %v1160_v13 = vpop.f32.mrf.mxu1  ;;  %v1098_v8 = vadd.f32 %v1097_v46, %v2436_v53  ;;  %v1324_v27 = vmax.f32 %v1096_v5, 0.0  ;;  %v1407_v38 = vmul.f32 %v2454_v31, %v1323_v17  ;;  %v1447_v21 = vadd.f32 %v1446_v42, %v1401_v34 }
 0x212   : > { %v1099_v58 = vpop.f32.mrf.mxu0  ;;  %v1161_v15 = vadd.f32 %v1160_v13, %v2436_v53  ;;  %v1326_v28 = vmax.f32 %v1159_v6, 0.0  ;;  %v1409_v45 = vmul.f32 %v2454_v31, %v1325_v25  ;;  %v1425_v46 = vadd.f32 %v1424_v32, %v1399_v26 }
 0x213   : > { %v1162_v2 = vpop.f32.mrf.mxu1  ;;  %v1100_v18 = vadd.f32 %v1099_v58, %v2436_v53  ;;  %v1331_v29 = vmax.f32 %v1098_v8, 0.0  ;;  %v1408_v13 = vmul.f32 %v2454_v31, %v1324_v27  ;;  %v1436_v49 = vadd.f32 %v1435_v43, %v1400_v35 }
 0x214   : > { %v1163_v20 = vadd.f32 %v1162_v2, %v2436_v53  ;;  %v1333_v36 = vmax.f32 %v1161_v15, 0.0  ;;  %v1410_v47 = vmul.f32 %v2454_v31, %v1326_v28  ;;  %v1458_v52 = vadd.f32 %v1457_v44, %v1402_v37 }
 0x215   : > { %v1332_v40 = vmax.f32 %v1100_v18, 0.0  ;;  %v1415_v48 = vmul.f32 %v2460_v41, %v1331_v29  ;;  %v1426_v3 = vadd.f32 %v1425_v46, %v1407_v38  ;;  %v1448_v54 = vadd.f32 %v1447_v21, %v1409_v45 }
 0x216   : > { %v1334_v0 = vmax.f32 %v1163_v20, 0.0  ;;  %v1417_v51 = vmul.f32 %v2460_v41, %v1333_v36  ;;  %v1437_v56 = vadd.f32 %v1436_v49, %v1408_v13  ;;  %v1459_v57 = vadd.f32 %v1458_v52, %v1410_v47 }
 0x217   : > { %v1416_v55 = vmul.f32 %v2460_v41, %v1332_v40  ;;  %v1427_v60 = vadd.f32 %v1426_v3, %v1415_v48  ;;  %v1517_v16 = vlaneseq }
 0x218   : > { %v1418_v50 = vmul.f32 %v2460_v41, %v1334_v0  ;;  %v1449_v61 = vadd.f32 %v1448_v54, %v1417_v51 }
 0x219   : > { %v1438_v62 = vadd.f32 %v1437_v56, %v1416_v55  ;;  %v1428_v58 = vrot.slane %v1427_v60, 4  ;;  %v2474_v35 = vshrl.u32 %v1517_v16, 7 }
 0x21a   : > { %v1460_v1 = vadd.f32 %v1459_v57, %v1418_v50  ;;  %v1450_v2 = vrot.slane %v1449_v61, 4 }
 0x21b   : > { %v1439_v30 = vrot.slane %v1438_v62, 4  ;;  %v1429_v6 = vadd.f32 %v1428_v58, %v1427_v60 }
 0x21c   : > { %v1461_v5 = vrot.slane %v1460_v1, 4  ;;  %v1451_v8 = vadd.f32 %v1450_v2, %v1449_v61 }
 0x21d   : > { %v1440_v11 = vadd.f32 %v1439_v30, %v1438_v62  ;;  %v1430_v22 = vrot.slane %v1429_v6, 2 }
 0x21e   : > { %v1462_v14 = vadd.f32 %v1461_v5, %v1460_v1  ;;  %v1452_v25 = vrot.slane %v1451_v8, 2 }
 0x21f   : > { %v1441_v28 = vrot.slane %v1440_v11, 2  ;;  %v2477_v0 = vadd.f32 %v1430_v22, %v1429_v6 }
 0x220   : > { %v1463_v29 = vrot.slane %v1462_v14, 2  ;;  %v2480_v45 = vadd.f32 %v1452_v25, %v1451_v8 }
 0x221   : > { %v2483_v21 = vadd.f32 %v1441_v28, %v1440_v11 }
 0x222   : > { %v2485_v49 = vadd.f32 %v1463_v29, %v1462_v14 }
 0x23c   : > { %v1199_v9 = vpop.f32.mrf.mxu0 }
 0x23d   : > { %v1262_v15 = vpop.f32.mrf.mxu1  ;;  %v1200_v17 = vadd.f32 %v1199_v9, %v2397_v63 }
 0x23e   : > { %v1263_v18 = vadd.f32 %v1262_v15, %v2397_v63  ;;  %v1201_v20 = vpop.f32.mrf.mxu0 }
 0x23f   : > { %v1202_v23 = vadd.f32 %v1201_v20, %v2397_v63  ;;  %v1264_v24 = vpop.f32.mrf.mxu1  ;;  %v1295_v36 = vmax.f32 %v1200_v17, 0.0 }
 0x240   : > { %v1265_v26 = vadd.f32 %v1264_v24, %v2397_v63  ;;  %v1203_v27 = vpop.f32.mrf.mxu0  ;;  %v1297_v37 = vmax.f32 %v1263_v18, 0.0 }
 0x241   : > { %v1204_v32 = vadd.f32 %v1203_v27, %v2399_v4  ;;  %v1266_v34 = vpop.f32.mrf.mxu1  ;;  %v1296_v42 = vmax.f32 %v1202_v23, 0.0  ;;  %v1379_v55 = vmul.f32 %v2407_v12, %v1295_v36 }
 0x242   : > { %v1267_v38 = vadd.f32 %v1266_v34, %v2399_v4  ;;  %v1205_v40 = vpop.f32.mrf.mxu0  ;;  %v1298_v46 = vmax.f32 %v1265_v26, 0.0  ;;  %v1381_v50 = vmul.f32 %v2407_v12, %v1297_v37 }
 0x243   : > { %v1303_v43 = vmax.f32 %v1204_v32, 0.0  ;;  %v1206_v44 = vadd.f32 %v1205_v40, %v2399_v4  ;;  %v1268_v63 = vpop.f32.mrf.mxu1  ;;  %v1380_v60 = vmul.f32 %v2407_v12, %v1296_v42 }
 0x244   : > { %v1305_v13 = vmax.f32 %v1267_v38, 0.0  ;;  %v1269_v47 = vadd.f32 %v1268_v63, %v2399_v4  ;;  %v1209_v48 = vpop.f32.mrf.mxu0  ;;  %v1382_v58 = vmul.f32 %v2407_v12, %v1298_v46 }
 0x245   : > { %v1304_v51 = vmax.f32 %v1206_v44, 0.0  ;;  %v1210_v52 = vadd.f32 %v1209_v48, %v2401_v7  ;;  %v1272_v3 = vpop.f32.mrf.mxu1  ;;  %v1387_v4 = vmul.f32 %v2412_v19, %v1303_v43 }
 0x246   : > { %v1306_v54 = vmax.f32 %v1269_v47, 0.0  ;;  %v1273_v56 = vadd.f32 %v1272_v3, %v2401_v7  ;;  %v1211_v57 = vpop.f32.mrf.mxu0  ;;  %v1389_v2 = vmul.f32 %v2412_v19, %v1305_v13 }
 0x247   : > { %v1311_v61 = vmax.f32 %v1210_v52, 0.0  ;;  %v1212_v62 = vadd.f32 %v1211_v57, %v2401_v7  ;;  %v1274_v1 = vpop.f32.mrf.mxu1  ;;  %v1388_v8 = vmul.f32 %v2412_v19, %v1304_v51  ;;  %v1467_v22 = vadd.f32 %v1387_v4, %v1379_v55 }
 0x248   : > { %v1313_v30 = vmax.f32 %v1273_v56, 0.0  ;;  %v1275_v5 = vadd.f32 %v1274_v1, %v2401_v7  ;;  %v1213_v6 = vpop.f32.mrf.mxu0  ;;  %v1390_v9 = vmul.f32 %v2412_v19, %v1306_v54  ;;  %v1489_v19 = vadd.f32 %v1389_v2, %v1381_v50 }
 0x249   : > { %v1312_v11 = vmax.f32 %v1212_v62, 0.0  ;;  %v1214_v14 = vadd.f32 %v1213_v6, %v2403_v59  ;;  %v1276_v15 = vpop.f32.mrf.mxu1  ;;  %v1395_v16 = vmul.f32 %v2422_v39, %v1311_v61  ;;  %v1478_v32 = vadd.f32 %v1388_v8, %v1380_v60 }
 0x24a   : > { %v1397_v17 = vmul.f32 %v2422_v39, %v1313_v30  ;;  %v1314_v18 = vmax.f32 %v1275_v5, 0.0  ;;  %v1277_v12 = vadd.f32 %v1276_v15, %v2403_v59  ;;  %v1215_v20 = vpop.f32.mrf.mxu0  ;;  %v1500_v34 = vadd.f32 %v1390_v9, %v1382_v58 }
 0x24b   : > { %v1396_v7 = vmul.f32 %v2422_v39, %v1312_v11  ;;  %v1319_v23 = vmax.f32 %v1214_v14, 0.0  ;;  %v1216_v24 = vadd.f32 %v1215_v20, %v2403_v59  ;;  %v1278_v25 = vpop.f32.mrf.mxu1  ;;  %v1468_v40 = vadd.f32 %v1467_v22, %v1395_v16 }
 0x24c   : > { %v1398_v26 = vmul.f32 %v2422_v39, %v1314_v18  ;;  %v1321_v27 = vmax.f32 %v1277_v12, 0.0  ;;  %v1279_v28 = vadd.f32 %v1278_v25, %v2403_v59  ;;  %v1219_v29 = vpop.f32.mrf.mxu0  ;;  %v1490_v42 = vadd.f32 %v1489_v19, %v1397_v17 }
 0x24d   : > { %v1320_v36 = vmax.f32 %v1216_v24, 0.0  ;;  %v1220_v37 = vadd.f32 %v1219_v29, %v2418_v33  ;;  %v1282_v38 = vpop.f32.mrf.mxu1  ;;  %v1479_v46 = vadd.f32 %v1478_v32, %v1396_v7  ;;  %v1403_v13 = vmul.f32 %v2445_v10, %v1319_v23  ;;  %v1515_v32 = vpop.permute.xlu0 %1514 }
 0x24e   : > { %v1322_v43 = vmax.f32 %v1279_v28, 0.0  ;;  %v1283_v44 = vadd.f32 %v1282_v38, %v2418_v33  ;;  %v1221_v63 = vpop.f32.mrf.mxu0  ;;  %v1501_v48 = vadd.f32 %v1500_v34, %v1398_v26  ;;  %v1405_v51 = vmul.f32 %v2445_v10, %v1321_v27 }
 0x24f   : > { %v1327_v39 = vmax.f32 %v1220_v37, 0.0  ;;  %v1222_v47 = vadd.f32 %v1221_v63, %v2418_v33  ;;  %v1284_v59 = vpop.f32.mrf.mxu1  ;;  %v1404_v50 = vmul.f32 %v2445_v10, %v1320_v36  ;;  %v1469_v2 = vadd.f32 %v1468_v40, %v1403_v13 }
 0x250   : > { %v1329_v52 = vmax.f32 %v1283_v44, 0.0  ;;  %v1285_v3 = vadd.f32 %v1284_v59, %v2418_v33  ;;  %v1223_v55 = vpop.f32.mrf.mxu0  ;;  %v1406_v4 = vmul.f32 %v2445_v10, %v1322_v43  ;;  %v1491_v8 = vadd.f32 %v1490_v42, %v1405_v51 }
 0x251   : > { %v1411_v54 = vmul.f32 %v2454_v31, %v1327_v39  ;;  %v1328_v56 = vmax.f32 %v1222_v47, 0.0  ;;  %v1224_v57 = vadd.f32 %v1223_v55, %v2436_v53  ;;  %v1286_v60 = vpop.f32.mrf.mxu1  ;;  %v1480_v10 = vadd.f32 %v1479_v46, %v1404_v50 }
 0x252   : > { %v1413_v61 = vmul.f32 %v2454_v31, %v1329_v52  ;;  %v1330_v62 = vmax.f32 %v1285_v3, 0.0  ;;  %v1287_v1 = vadd.f32 %v1286_v60, %v2436_v53  ;;  %v1225_v58 = vpop.f32.mrf.mxu0  ;;  %v1502_v18 = vadd.f32 %v1501_v48, %v1406_v4 }
 0x253   : > { %v1412_v33 = vmul.f32 %v2454_v31, %v1328_v56  ;;  %v1335_v30 = vmax.f32 %v1224_v57, 0.0  ;;  %v1226_v5 = vadd.f32 %v1225_v58, %v2436_v53  ;;  %v1288_v6 = vpop.f32.mrf.mxu1  ;;  %v1470_v15 = vadd.f32 %v1469_v2, %v1411_v54 }
 0x254   : > { %v1414_v9 = vmul.f32 %v2454_v31, %v1330_v62  ;;  %v1337_v11 = vmax.f32 %v1287_v1, 0.0  ;;  %v1289_v14 = vadd.f32 %v1288_v6, %v2436_v53  ;;  %v1492_v12 = vadd.f32 %v1491_v8, %v1413_v61 }
 0x255   : > { %v1419_v16 = vmul.f32 %v2460_v41, %v1335_v30  ;;  %v1336_v17 = vmax.f32 %v1226_v5, 0.0  ;;  %v1443_v7 = vrot.slane %v2483_v21, 1  ;;  %v1481_v23 = vadd.f32 %v1480_v10, %v1412_v33 }
 0x256   : > { %v1421_v20 = vmul.f32 %v2460_v41, %v1337_v11  ;;  %v1338_v22 = vmax.f32 %v1289_v14, 0.0  ;;  %v1465_v31 = vrot.slane %v2485_v49, 1  ;;  %v1503_v19 = vadd.f32 %v1502_v18, %v1414_v9 }
 0x257   : > { %v1471_v24 = vadd.f32 %v1470_v15, %v1419_v16  ;;  %v1420_v25 = vmul.f32 %v2460_v41, %v1336_v17  ;;  %v1519_v27 = vsub.s32 0, %v2474_v35  ;;  %v1432_v34 = vrot.slane %v2477_v0, 1 }
 0x258   : > { %v1493_v53 = vadd.f32 %v1492_v12, %v1421_v20  ;;  %v1422_v26 = vmul.f32 %v2460_v41, %v1338_v22  ;;  %v1454_v36 = vrot.slane %v2480_v45, 1  ;;  %v1923_v40 = vmov 1966171168  }
 0x259   : > { %v1472_v28 = vrot.slane %v1471_v24, 4  ;;  %v1482_v29 = vadd.f32 %v1481_v23, %v1420_v25  ;;  %v1542_v42 = vunpack.c.l.s4 %v1923_v40  ;;  %v1444_v63 = vadd.f32 %v1443_v7, %v2483_v21 }
 0x25a   : > { %v1494_v37 = vrot.slane %v1493_v53, 4  ;;  %v1504_v38 = vadd.f32 %v1503_v19, %v1422_v26  ;;  %v1466_v46 = vadd.f32 %v1465_v31, %v2485_v49  ;;  %v1520_v39 = vrot.slane %v1515_v32, %v1519_v27 }
 0x25b   : > { %v1473_v43 = vadd.f32 %v1472_v28, %v1471_v24  ;;  %v1483_v44 = vrot.slane %v1482_v29, 4  ;;  %v1433_v48 = vadd.f32 %v1432_v34, %v2477_v0  ;;  %v1455_v51 = vadd.f32 %v1454_v36, %v2480_v45 }
 0x25c   : > { %v1495_v41 = vadd.f32 %v1494_v37, %v1493_v53  ;;  %v1505_v13 = vrot.slane %v1504_v38, 4  ;;  %v1543_v55 = vunpack.c.0.s8 %v1542_v42  ;;  %v1522_v56 = vadd.f32 %v1520_v39, %v1444_v63 }
 0x25d   : > { %v1474_v47 = vrot.slane %v1473_v43, 2  ;;  %v1484_v59 = vadd.f32 %v1483_v44, %v1482_v29  ;;  %v1524_v57 = vadd.f32 %v1520_v39, %v1466_v46  ;;  %v1521_v61 = vadd.f32 %v1520_v39, %v1433_v48 }
 0x25e   : > { %v1496_v52 = vrot.slane %v1495_v41, 2  ;;  %v1506_v3 = vadd.f32 %v1505_v13, %v1504_v38  ;;  %v1523_v62 = vadd.f32 %v1520_v39, %v1455_v51  ;;  %v1546_v0 = vsub.s32 %v1543_v55, %v2474_v35 }
 0x25f   : > { %v1475_v50 = vadd.f32 %v1474_v47, %v1473_v43  ;;  %v1485_v54 = vrot.slane %v1484_v59, 2  ;;  %v1537_v5 = vcombine.low %v1521_v61, %v1522_v56 }
 0x260   : > { %v1497_v60 = vadd.f32 %v1496_v52, %v1495_v41  ;;  %v1507_v21 = vrot.slane %v1506_v3, 2  ;;  %v1538_v6 = vcombine.low %v1523_v62, %v1524_v57 }
 0x261   : > { %v1476_v49 = vrot.slane %v1475_v50, 1  ;;  %v1486_v4 = vadd.f32 %v1485_v54, %v1484_v59  ;;  %v1547_v16 = vrot.slane %v1537_v5, %v1546_v0 }
 0x262   : > { %v1498_v1 = vrot.slane %v1497_v60, 1  ;;  %v1508_v58 = vadd.f32 %v1507_v21, %v1506_v3  ;;  %v1554_v17 = vrot.slane %v1538_v6, %v1546_v0 }
 0x263   : > { %v1477_v2 = vadd.f32 %v1476_v49, %v1475_v50  ;;  %v1487_v45 = vrot.slane %v1486_v4, 1 }
 0x264   : > { %v1499_v33 = vadd.f32 %v1498_v1, %v1497_v60  ;;  %v1509_v30 = vrot.slane %v1508_v58, 1  ;;  %v1569_v22 = vcombine.low %v1547_v16, %v1554_v17 }
 0x265   : > { %v1488_v8 = vadd.f32 %v1487_v45, %v1486_v4  ;;  %v1525_v11 = vadd.f32 %v1520_v39, %v1477_v2 }
 0x266   : > { %v1510_v9 = vadd.f32 %v1509_v30, %v1508_v58  ;;  %v1527_v10 = vadd.f32 %v1520_v39, %v1499_v33  ;;  %v1577_v23 = vrot.slane %v1569_v22, %v1546_v0 }
 0x267   : > { %v1526_v14 = vadd.f32 %v1520_v39, %v1488_v8 }
 0x268   : > { %v1528_v15 = vadd.f32 %v1520_v39, %v1510_v9 }
 0x269   : > { %v1539_v18 = vcombine.low %v1525_v11, %v1526_v14 }
 0x26a   : > { %v1540_v12 = vcombine.low %v1527_v10, %v1528_v15 }
 0x26b   : > { %v1561_v35 = vrot.slane %v1539_v18, %v1546_v0 }
 0x26c   : > { %v1568_v20 = vrot.slane %v1540_v12, %v1546_v0 }
 0x26e   : > { %v1570_v7 = vcombine.low %v1561_v35, %v1568_v20 }
 0x270   : > { %v1584_v24 = vrot.slane %v1570_v7, %v1546_v0 }
 0x272   : > { %v1585_v25 = vcombine.low %v1577_v23, %v1584_v24 }
 0x274   : > { %1587 = vst [vmem:[%s274_s20] sm:$0xff] %v1585_v25 }
 0x275   : > { %1873 = shalt.err (!%p1870_p3)
}
 0x276   : > { %s1874_s15 = scalar_lea.hbm %s1601_s25, 128  ;;  %s1878_s17 = scalar_lea.hbm %s2578_s7, 512 }
 0x277   : > { %p1875_p4 = scmp.ne.s32.totalorder %s1601_s25, %s1874_s15  ;;  %p1879_p9 = scmp.lt.s32.totalorder %s1601_s25, %s2578_s7 }
 0x278   : > { %p1880_p10 = scmp.lt.s32.totalorder %s1878_s17, %s1874_s15 }
 0x279   : > { %p1876_p7 = pnand %p1875_p4, %p2003_p5 }
 0x27a   : > { %p1881_p11 = por %p1880_p10, %p1879_p9 }
 0x27b   : > { %p1877_p8 = pneg %p1876_p7 }
 0x27d   : > { %p1882_p12 = pnand %p1881_p11, %p1877_p8 }
 0x27f   : > { %1885 = shalt.err (!%p1882_p12)
}
 0x280   : > { %1812 = dma.vmem_to_hbm [thread:$0]  (%p2003_p5), %s1604_s22, 128, %s1601_s25, %s1589_s6  }
 0x281 PF: > { %p1818_p13 = scmp.ge.s32.totalorder %s1920_s29, 2  ;;  %s1615_s20 = sand.u32 1, %s1908_s26  }
 0x282   : > { %s1616_s23 = scalar_lea.sflag [#allocation4], %s1615_s20 }
 0x283   : > { %p1815_p0 = pnand %p1818_p13, %p2007_p6 }
 0x285   : > { %p1816_p1 = pneg %p1815_p0 }
 0x287   : > { %1903 = dma.done.wait (%p1816_p1), %s1616_s23, 128  }
 0x288   : > { %1905 = vsyncadd (%p1816_p1), %s1616_s23, 4294967168  ;;  %p19_p2 = scmp.ge.s32.totalorder %s1991_s8, 6   ;;  %s2581_s26 = smov %s1912_s27 }
 0x289   : > { %s2582_s27 = smov %s1916_s28  ;;  %s2583_s28 = smov %s2001_s11 }
 0x28a   : > { %s2584_s29 = smov %s1991_s8  ;;  %21 = sbr.rel (!%p19_p2) target bundleno = 6 (0x6), region = 83 }
 0x28f   :  { %1621 = vsyncpa [#allocation4], 1 }
 0x290   :  { %1623 = vsyncpa [#allocation4 + $0x1], 1 }

</bundles_post_ra>
